<compile_context>
chip_gen: v7x
topology: tpu7x:2x2x1
jax: 0.10.0
libtpu: 0.0.40
codegen_flags: <defaults>
</compile_context>

<pallas_src>
import jax
import jax.numpy as jnp
import numpy as np
from jax.experimental import pallas as pl
from jax.experimental.pallas import tpu as pltpu

K_PADDING = 1
STRIDE = 2
BN_EPS = 1e-5
CONV_CFG = ((3, 6, 4), (6, 12, 2), (12, 24, 2))   # (cin, cout, kernel)
N_CLASSES = 3


def _get_output_size(width, filter_size, stride, padding):
    return (width - filter_size + 2 * padding) // stride + 1


# ----------------------------------------------------------------------------
# Fused forward kernel: 6 matmuls + elementwise, nothing else.
# ----------------------------------------------------------------------------
def _sccnet_kernel(a_ref,
                   w1_ref, b1_ref, s1_ref,
                   w2_ref, b2_ref, s2_ref,
                   w3_ref, b3_ref, s3_ref,
                   wf1_ref, bf1_ref, wf2_ref, bf2_ref, wf3_ref, bf3_ref,
                   o_ref):
    a = a_ref[...]                                   # (bt, H*W*C) flat slab

    # 3x [ReflectionPad2d(1) -> Conv2d(stride 2) -> ReLU -> BatchNorm2d(eval)],
    # each folded into one dense matmul + bias + ReLU + per-channel shift.
    for w_ref, b_ref, s_ref in ((w1_ref, b1_ref, s1_ref),
                                (w2_ref, b2_ref, s2_ref),
                                (w3_ref, b3_ref, s3_ref)):
        z = jnp.dot(a, w_ref[...], preferred_element_type=jnp.float32)
        a = jnp.maximum(z + b_ref[...], 0.0) + s_ref[...]

    # Linear(216,64)+ReLU -> Linear(64,32)+Tanh -> Linear(32,3)+Softmax.
    x = jnp.maximum(
        jnp.dot(a, wf1_ref[...], preferred_element_type=jnp.float32)
        + bf1_ref[...], 0.0)
    x = jnp.tanh(
        jnp.dot(x, wf2_ref[...], preferred_element_type=jnp.float32)
        + bf2_ref[...])
    logits = (jnp.dot(x, wf3_ref[...], preferred_element_type=jnp.float32)
              + bf3_ref[...])

    m = jnp.max(logits, axis=-1, keepdims=True)
    e = jnp.exp(logits - m)
    o_ref[...] = e / jnp.sum(e, axis=-1, keepdims=True)   # exact softmax


def scc_net_forward(x, kernel_params, *, batch_block=128):
    """x: (N, 3, H, W) float32 (PyTorch NCHW). Returns softmax probs (N, 3)."""
    n, c, h, w = x.shape
    flat_in = c * h * w
    a0 = x.reshape(n, flat_in)        # torch (c, h, w) flatten; order is baked
                                      # into the stage-1 dense weight rows.

    bt = n if n <= batch_block else batch_block
    n_pad = pl.cdiv(n, bt) * bt
    if n_pad != n:
        a0 = jnp.pad(a0, ((0, n_pad - n), (0, 0)))

    act_spec = pl.BlockSpec((bt, flat_in), lambda i: (i, 0))
    out_spec = pl.BlockSpec((bt, N_CLASSES), lambda i: (i, 0))
    # Weights: full-array blocks with a constant index_map -> VMEM resident
    # across all grid steps (no re-DMA per batch tile).
    w_specs = [pl.BlockSpec(tuple(p.shape), lambda i: (0, 0))
               for p in kernel_params]

    out = pl.pallas_call(
        _sccnet_kernel,
        out_shape=jax.ShapeDtypeStruct((n_pad, N_CLASSES), jnp.float32),
        grid=(n_pad // bt,),
        in_specs=[act_spec] + w_specs,
        out_specs=out_spec,
        compiler_params=pltpu.CompilerParams(
            dimension_semantics=("parallel",),          # shard batch over TCs
            vmem_limit_bytes=32 * 1024 * 1024),         # sized for v7x budget
    )(a0, *kernel_params)
    return out[:n]


# ----------------------------------------------------------------------------
# Parameters: synthetic PyTorch-layout params + host-side prep (runs once).
# ----------------------------------------------------------------------------
def init_torch_params(key, target_size):
    """Deterministic synthetic parameters in the original PyTorch layouts."""
    keys = jax.random.split(key, 20)
    ki = 0
    conv = []
    for cin, cout, k in CONV_CFG:
        w = 0.1 * jax.random.normal(keys[ki], (cout, cin, k, k), jnp.float32); ki += 1
        b = 0.05 * jax.random.normal(keys[ki], (cout,), jnp.float32); ki += 1
        # gamma strictly positive so eval-mode BN can be folded through ReLU.
        gamma = 1.0 + 0.1 * jax.random.uniform(keys[ki], (cout,), jnp.float32); ki += 1
        beta = 0.05 * jax.random.normal(keys[ki], (cout,), jnp.float32); ki += 1
        mean = 0.05 * jnp.arange(cout, dtype=jnp.float32)
        var = 1.0 + 0.01 * jnp.arange(cout, dtype=jnp.float32)
        conv.append(dict(w=w, b=b, gamma=gamma, beta=beta, mean=mean, var=var))

    o1 = _get_output_size(target_size, 4, STRIDE, K_PADDING)
    o2 = _get_output_size(o1, 2, STRIDE, K_PADDING)
    o3 = _get_output_size(o2, 2, STRIDE, K_PADDING)
    flat_dim = o3 * o3 * 24
    fc = []
    for din, dout in ((flat_dim, 64), (64, 32), (32, N_CLASSES)):
        w = 0.1 * jax.random.normal(keys[ki], (dout, din), jnp.float32); ki += 1  # torch (out, in)
        b = 0.05 * jax.random.normal(keys[ki], (dout,), jnp.float32); ki += 1
        fc.append((w, b))
    return conv, fc


def _reflect(p, size):
    """ReflectionPad2d(1): padded index p in [0, size+1] -> original index."""
    if p == 0:
        return 1
    if p == size + 1:
        return size - 2
    return p - 1


def _dense_conv_weight(w_sc, h_in, k, input_order):
    """Dense block-Toeplitz matrix for ReflectionPad2d(1) + Conv2d(k, stride 2).

    Rows index the flattened square input image ('chw' or 'hwc' order);
    columns index the flattened (oh, ow, cout) output.  Reflection padding and
    the stride-2 window gather live entirely in the row pattern; reflected
    positions that alias the same source pixel accumulate (+=).
    """
    cout, cin = w_sc.shape[0], w_sc.shape[1]
    oh = _get_output_size(h_in, k, STRIDE, K_PADDING)
    dense = np.zeros((h_in * h_in * cin, oh * oh * cout), np.float32)
    for oy in range(oh):
        for ox in range(oh):
            col0 = (oy * oh + ox) * cout
            for kh in range(k):
                ry = _reflect(STRIDE * oy + kh, h_in)
                for kw in range(k):
                    rx = _reflect(STRIDE * ox + kw, h_in)
                    blk = w_sc[:, :, kh, kw].T                 # (cin, cout)
                    if input_order == "chw":
                        rows = (np.arange(cin) * h_in + ry) * h_in + rx
                        dense[rows, col0:col0 + cout] += blk
                    else:  # "hwc"
                        row0 = (ry * h_in + rx) * cin
                        dense[row0:row0 + cin, col0:col0 + cout] += blk
    return dense, oh


def prepare_kernel_params(conv, fc, target_size):
    """Fold BN + reflection pad + stride-2 im2col into dense per-stage weight
    matrices and permute the fc1 weight to the kernel's (h, w, c) lane order.
    Host-side, runs once; returns device arrays (hoist & reuse across calls)."""
    flat = []
    size = target_size
    input_order = "chw"          # stage-1 LHS is x.reshape(N, -1): torch (c,h,w)
    for p, (cin, cout, k) in zip(conv, CONV_CFG):
        w = np.asarray(p["w"], np.float32)
        b = np.asarray(p["b"], np.float32)
        scale = np.asarray(p["gamma"], np.float32) / np.sqrt(
            np.asarray(p["var"], np.float32) + BN_EPS)
        shift = (np.asarray(p["beta"], np.float32)
                 - np.asarray(p["mean"], np.float32) * scale)
        # Folding eval-mode BN through ReLU requires a positive scale.
        assert np.all(scale > 0.0), "folding BN through ReLU requires scale > 0"

        w_sc = w * scale[:, None, None, None]                  # fold BN scale
        dense, oh = _dense_conv_weight(w_sc, size, k, input_order)
        b_row = np.tile(b * scale, oh * oh)[None, :].astype(np.float32)
        s_row = np.tile(shift, oh * oh)[None, :].astype(np.float32)
        flat += [jnp.asarray(dense), jnp.asarray(b_row), jnp.asarray(s_row)]
        size = oh
        input_order = "hwc"      # conv-stage outputs are laid out (h, w, c)

    o3 = size
    (w1, b1), (w2, b2), (w3, b3) = fc
    w1 = np.asarray(w1, np.float32)
    # PyTorch x.view(N, -1) flattens NCHW as (c, h, w); the kernel slab is
    # (h, w, c), so permute the fc1 weight rows accordingly.
    w1p = (w1.T.reshape(24, o3, o3, 64)        # [c, h, w, out]
           .transpose(1, 2, 0, 3)              # [h, w, c, out]
           .reshape(o3 * o3 * 24, 64))
    flat += [jnp.asarray(w1p), jnp.asarray(np.asarray(b1, np.float32)[None, :])]
    flat += [jnp.asarray(np.asarray(w2, np.float32).T),
             jnp.asarray(np.asarray(b2, np.float32)[None, :])]
    flat += [jnp.asarray(np.asarray(w3, np.float32).T),
             jnp.asarray(np.asarray(b3, np.float32)[None, :])]
    return tuple(flat)


# ----------------------------------------------------------------------------
# Pure-JAX/XLA reference (mirrors the PyTorch module op-for-op, BN eval mode)
# ----------------------------------------------------------------------------
def reference_forward(x, conv, fc):
    for p, (_, _, k) in zip(conv, CONV_CFG):
        x = jnp.pad(x, ((0, 0), (0, 0), (1, 1), (1, 1)), mode="reflect")
        x = jax.lax.conv_general_dilated(
            x, p["w"], window_strides=(STRIDE, STRIDE), padding="VALID",
            dimension_numbers=("NCHW", "OIHW", "NCHW"))
        x = jnp.maximum(x + p["b"][None, :, None, None], 0.0)
        inv = (p["gamma"] / jnp.sqrt(p["var"] + BN_EPS))[None, :, None, None]
        x = (x - p["mean"][None, :, None, None]) * inv + p["beta"][None, :, None, None]
    x = x.reshape(x.shape[0], -1)
    (w1, b1), (w2, b2), (w3, b3) = fc
    x = jnp.maximum(x @ w1.T + b1, 0.0)
    x = jnp.tanh(x @ w2.T + b2)
    x = x @ w3.T + b3
    return jax.nn.softmax(x, axis=-1)


if __name__ == "__main__":
    target_size = 16                    # small spatial size consistent with the module
    batch = 2
    key = jax.random.PRNGKey(0)
    k_in, k_params = jax.random.split(key)
    x = jax.random.normal(k_in, (batch, 3, target_size, target_size), jnp.float32)

    conv_p, fc_p = init_torch_params(k_params, target_size)
    kparams = prepare_kernel_params(conv_p, fc_p, target_size)

    fwd = jax.jit(scc_net_forward)
    out = jax.block_until_ready(fwd(x, kparams))

    assert out.shape == (batch, N_CLASSES)
    # exact softmax divide -> rows sum to 1 tightly
    assert bool(jnp.all(jnp.abs(jnp.sum(out, axis=-1) - 1.0) < 1e-4))
    # matches the pure-XLA PyTorch-equivalent reference
    ref = reference_forward(x, conv_p, fc_p)
    np.testing.assert_allclose(np.asarray(out), np.asarray(ref),
                               atol=1e-3, rtol=1e-3)
    print("KERNEL_OK")
</pallas_src>

<mosaic_0001>
module attributes {stable_mosaic.version = 11 : i64} {
  func.func @_sccnet_kernel(%arg0: i32, %arg1: memref<2x768xf32, #tpu.memory_space<vmem>>, %arg2: memref<768x384xf32, #tpu.memory_space<vmem>>, %arg3: memref<1x384xf32, #tpu.memory_space<vmem>>, %arg4: memref<1x384xf32, #tpu.memory_space<vmem>>, %arg5: memref<384x300xf32, #tpu.memory_space<vmem>>, %arg6: memref<1x300xf32, #tpu.memory_space<vmem>>, %arg7: memref<1x300xf32, #tpu.memory_space<vmem>>, %arg8: memref<300x216xf32, #tpu.memory_space<vmem>>, %arg9: memref<1x216xf32, #tpu.memory_space<vmem>>, %arg10: memref<1x216xf32, #tpu.memory_space<vmem>>, %arg11: memref<216x64xf32, #tpu.memory_space<vmem>>, %arg12: memref<1x64xf32, #tpu.memory_space<vmem>>, %arg13: memref<64x32xf32, #tpu.memory_space<vmem>>, %arg14: memref<1x32xf32, #tpu.memory_space<vmem>>, %arg15: memref<32x3xf32, #tpu.memory_space<vmem>>, %arg16: memref<1x3xf32, #tpu.memory_space<vmem>>, %arg17: memref<2x3xf32, #tpu.memory_space<vmem>>) attributes {dimension_semantics = [#tpu.dimension_semantics<parallel>], iteration_bounds = array<i64: 1>, scalar_prefetch = 0 : i64, scratch_operands = 0 : i64, tpu.core_type = #tpu.core_type<tc>, window_params = [{transform_indices = @transform_0, window_bounds = array<i64: 2, 768>}, {pipeline_mode = #tpu.pipeline_mode<synchronous>, transform_indices = @transform_1, window_bounds = array<i64: 768, 384>}, {pipeline_mode = #tpu.pipeline_mode<synchronous>, transform_indices = @transform_2, window_bounds = array<i64: 1, 384>}, {pipeline_mode = #tpu.pipeline_mode<synchronous>, transform_indices = @transform_3, window_bounds = array<i64: 1, 384>}, {pipeline_mode = #tpu.pipeline_mode<synchronous>, transform_indices = @transform_4, window_bounds = array<i64: 384, 300>}, {pipeline_mode = #tpu.pipeline_mode<synchronous>, transform_indices = @transform_5, window_bounds = array<i64: 1, 300>}, {pipeline_mode = #tpu.pipeline_mode<synchronous>, transform_indices = @transform_6, window_bounds = array<i64: 1, 300>}, {pipeline_mode = #tpu.pipeline_mode<synchronous>, transform_indices = @transform_7, window_bounds = array<i64: 300, 216>}, {pipeline_mode = #tpu.pipeline_mode<synchronous>, transform_indices = @transform_8, window_bounds = array<i64: 1, 216>}, {pipeline_mode = #tpu.pipeline_mode<synchronous>, transform_indices = @transform_9, window_bounds = array<i64: 1, 216>}, {pipeline_mode = #tpu.pipeline_mode<synchronous>, transform_indices = @transform_10, window_bounds = array<i64: 216, 64>}, {pipeline_mode = #tpu.pipeline_mode<synchronous>, transform_indices = @transform_11, window_bounds = array<i64: 1, 64>}, {pipeline_mode = #tpu.pipeline_mode<synchronous>, transform_indices = @transform_12, window_bounds = array<i64: 64, 32>}, {pipeline_mode = #tpu.pipeline_mode<synchronous>, transform_indices = @transform_13, window_bounds = array<i64: 1, 32>}, {pipeline_mode = #tpu.pipeline_mode<synchronous>, transform_indices = @transform_14, window_bounds = array<i64: 32, 3>}, {pipeline_mode = #tpu.pipeline_mode<synchronous>, transform_indices = @transform_15, window_bounds = array<i64: 1, 3>}, {transform_indices = @transform_16, window_bounds = array<i64: 2, 3>}]} {
    %c0 = arith.constant 0 : index
    %c0_0 = arith.constant 0 : index
    %0 = vector.load %arg1[%c0, %c0_0] : memref<2x768xf32, #tpu.memory_space<vmem>>, vector<2x768xf32>
    %c0_1 = arith.constant 0 : index
    %c0_2 = arith.constant 0 : index
    %1 = vector.load %arg2[%c0_1, %c0_2] : memref<768x384xf32, #tpu.memory_space<vmem>>, vector<768x384xf32>
    %cst = arith.constant dense<0.000000e+00> : vector<2x384xf32>
    %2 = tpu.matmul %0, %1, %cst {dimension_numbers = #tpu.dot_dimension_numbers<[1], [0], [0], [1], [0, 0, 1, 1], [], []>} : vector<2x768xf32>, vector<768x384xf32>, vector<2x384xf32> -> vector<2x384xf32>
    %c0_3 = arith.constant 0 : index
    %c0_4 = arith.constant 0 : index
    %3 = vector.load %arg3[%c0_3, %c0_4] : memref<1x384xf32, #tpu.memory_space<vmem>>, vector<1x384xf32>
    %4 = vector.broadcast %3 : vector<1x384xf32> to vector<2x384xf32>
    %5 = arith.addf %2, %4 : vector<2x384xf32>
    %cst_5 = arith.constant 0.000000e+00 : f32
    %6 = vector.broadcast %cst_5 : f32 to vector<2x384xf32>
    %7 = arith.maximumf %5, %6 : vector<2x384xf32>
    %c0_6 = arith.constant 0 : index
    %c0_7 = arith.constant 0 : index
    %8 = vector.load %arg4[%c0_6, %c0_7] : memref<1x384xf32, #tpu.memory_space<vmem>>, vector<1x384xf32>
    %9 = vector.broadcast %8 : vector<1x384xf32> to vector<2x384xf32>
    %10 = arith.addf %7, %9 : vector<2x384xf32>
    %c0_8 = arith.constant 0 : index
    %c0_9 = arith.constant 0 : index
    %11 = vector.load %arg5[%c0_8, %c0_9] : memref<384x300xf32, #tpu.memory_space<vmem>>, vector<384x300xf32>
    %cst_10 = arith.constant dense<0.000000e+00> : vector<2x300xf32>
    %12 = tpu.matmul %10, %11, %cst_10 {dimension_numbers = #tpu.dot_dimension_numbers<[1], [0], [0], [1], [0, 0, 1, 1], [], []>} : vector<2x384xf32>, vector<384x300xf32>, vector<2x300xf32> -> vector<2x300xf32>
    %c0_11 = arith.constant 0 : index
    %c0_12 = arith.constant 0 : index
    %13 = vector.load %arg6[%c0_11, %c0_12] : memref<1x300xf32, #tpu.memory_space<vmem>>, vector<1x300xf32>
    %14 = vector.broadcast %13 : vector<1x300xf32> to vector<2x300xf32>
    %15 = arith.addf %12, %14 : vector<2x300xf32>
    %cst_13 = arith.constant 0.000000e+00 : f32
    %16 = vector.broadcast %cst_13 : f32 to vector<2x300xf32>
    %17 = arith.maximumf %15, %16 : vector<2x300xf32>
    %c0_14 = arith.constant 0 : index
    %c0_15 = arith.constant 0 : index
    %18 = vector.load %arg7[%c0_14, %c0_15] : memref<1x300xf32, #tpu.memory_space<vmem>>, vector<1x300xf32>
    %19 = vector.broadcast %18 : vector<1x300xf32> to vector<2x300xf32>
    %20 = arith.addf %17, %19 : vector<2x300xf32>
    %c0_16 = arith.constant 0 : index
    %c0_17 = arith.constant 0 : index
    %21 = vector.load %arg8[%c0_16, %c0_17] : memref<300x216xf32, #tpu.memory_space<vmem>>, vector<300x216xf32>
    %cst_18 = arith.constant dense<0.000000e+00> : vector<2x216xf32>
    %22 = tpu.matmul %20, %21, %cst_18 {dimension_numbers = #tpu.dot_dimension_numbers<[1], [0], [0], [1], [0, 0, 1, 1], [], []>} : vector<2x300xf32>, vector<300x216xf32>, vector<2x216xf32> -> vector<2x216xf32>
    %c0_19 = arith.constant 0 : index
    %c0_20 = arith.constant 0 : index
    %23 = vector.load %arg9[%c0_19, %c0_20] : memref<1x216xf32, #tpu.memory_space<vmem>>, vector<1x216xf32>
    %24 = vector.broadcast %23 : vector<1x216xf32> to vector<2x216xf32>
    %25 = arith.addf %22, %24 : vector<2x216xf32>
    %cst_21 = arith.constant 0.000000e+00 : f32
    %26 = vector.broadcast %cst_21 : f32 to vector<2x216xf32>
    %27 = arith.maximumf %25, %26 : vector<2x216xf32>
    %c0_22 = arith.constant 0 : index
    %c0_23 = arith.constant 0 : index
    %28 = vector.load %arg10[%c0_22, %c0_23] : memref<1x216xf32, #tpu.memory_space<vmem>>, vector<1x216xf32>
    %29 = vector.broadcast %28 : vector<1x216xf32> to vector<2x216xf32>
    %30 = arith.addf %27, %29 : vector<2x216xf32>
    %c0_24 = arith.constant 0 : index
    %c0_25 = arith.constant 0 : index
    %31 = vector.load %arg11[%c0_24, %c0_25] : memref<216x64xf32, #tpu.memory_space<vmem>>, vector<216x64xf32>
    %cst_26 = arith.constant dense<0.000000e+00> : vector<2x64xf32>
    %32 = tpu.matmul %30, %31, %cst_26 {dimension_numbers = #tpu.dot_dimension_numbers<[1], [0], [0], [1], [0, 0, 1, 1], [], []>} : vector<2x216xf32>, vector<216x64xf32>, vector<2x64xf32> -> vector<2x64xf32>
    %c0_27 = arith.constant 0 : index
    %c0_28 = arith.constant 0 : index
    %33 = vector.load %arg12[%c0_27, %c0_28] : memref<1x64xf32, #tpu.memory_space<vmem>>, vector<1x64xf32>
    %34 = vector.broadcast %33 : vector<1x64xf32> to vector<2x64xf32>
    %35 = arith.addf %32, %34 : vector<2x64xf32>
    %cst_29 = arith.constant 0.000000e+00 : f32
    %36 = vector.broadcast %cst_29 : f32 to vector<2x64xf32>
    %37 = arith.maximumf %35, %36 : vector<2x64xf32>
    %c0_30 = arith.constant 0 : index
    %c0_31 = arith.constant 0 : index
    %38 = vector.load %arg13[%c0_30, %c0_31] : memref<64x32xf32, #tpu.memory_space<vmem>>, vector<64x32xf32>
    %cst_32 = arith.constant dense<0.000000e+00> : vector<2x32xf32>
    %39 = tpu.matmul %37, %38, %cst_32 {dimension_numbers = #tpu.dot_dimension_numbers<[1], [0], [0], [1], [0, 0, 1, 1], [], []>} : vector<2x64xf32>, vector<64x32xf32>, vector<2x32xf32> -> vector<2x32xf32>
    %c0_33 = arith.constant 0 : index
    %c0_34 = arith.constant 0 : index
    %40 = vector.load %arg14[%c0_33, %c0_34] : memref<1x32xf32, #tpu.memory_space<vmem>>, vector<1x32xf32>
    %41 = vector.broadcast %40 : vector<1x32xf32> to vector<2x32xf32>
    %42 = arith.addf %39, %41 : vector<2x32xf32>
    %43 = math.tanh %42 : vector<2x32xf32>
    %c0_35 = arith.constant 0 : index
    %c0_36 = arith.constant 0 : index
    %44 = vector.load %arg15[%c0_35, %c0_36] : memref<32x3xf32, #tpu.memory_space<vmem>>, vector<32x3xf32>
    %cst_37 = arith.constant dense<0.000000e+00> : vector<2x3xf32>
    %45 = tpu.matmul %43, %44, %cst_37 {dimension_numbers = #tpu.dot_dimension_numbers<[1], [0], [0], [1], [0, 0, 1, 1], [], []>} : vector<2x32xf32>, vector<32x3xf32>, vector<2x3xf32> -> vector<2x3xf32>
    %c0_38 = arith.constant 0 : index
    %c0_39 = arith.constant 0 : index
    %46 = vector.load %arg16[%c0_38, %c0_39] : memref<1x3xf32, #tpu.memory_space<vmem>>, vector<1x3xf32>
    %47 = vector.broadcast %46 : vector<1x3xf32> to vector<2x3xf32>
    %48 = arith.addf %45, %47 : vector<2x3xf32>
    %cst_40 = arith.constant dense<0xFF800000> : vector<2xf32>
    %49 = vector.multi_reduction <maximumf>, %48, %cst_40 [1] : vector<2x3xf32> to vector<2xf32>
    %50 = vector.shape_cast %49 : vector<2xf32> to vector<2x1xf32>
    %51 = vector.broadcast %50 : vector<2x1xf32> to vector<2x3xf32>
    %52 = arith.subf %48, %51 : vector<2x3xf32>
    %53 = math.exp %52 : vector<2x3xf32>
    %cst_41 = arith.constant dense<0.000000e+00> : vector<2xf32>
    %54 = vector.multi_reduction <add>, %53, %cst_41 [1] : vector<2x3xf32> to vector<2xf32>
    %55 = vector.shape_cast %54 : vector<2xf32> to vector<2x1xf32>
    %56 = vector.broadcast %55 : vector<2x1xf32> to vector<2x3xf32>
    %57 = arith.divf %53, %56 : vector<2x3xf32>
    %c0_42 = arith.constant 0 : index
    %c0_43 = arith.constant 0 : index
    %58 = vector.load %arg17[%c0_42, %c0_43] : memref<2x3xf32, #tpu.memory_space<vmem>>, vector<2x3xf32>
    tpu.vector_store %arg17[%c0_42, %c0_43], %57 {strides = array<i32>} : memref<2x3xf32, #tpu.memory_space<vmem>>, vector<2x3xf32>,
    return
  }
  func.func @transform_0(%arg0: i32) -> (i32, i32) {
    %c0_i32 = arith.constant 0 : i32
    %c0_i32_0 = arith.constant 0 : i32
    return %arg0, %c0_i32 : i32, i32
  }
  func.func @transform_1(%arg0: i32) -> (i32, i32) {
    %c0_i32 = arith.constant 0 : i32
    %c0_i32_0 = arith.constant 0 : i32
    %c0_i32_1 = arith.constant 0 : i32
    return %c0_i32, %c0_i32_0 : i32, i32
  }
  func.func @transform_2(%arg0: i32) -> (i32, i32) {
    %c0_i32 = arith.constant 0 : i32
    %c0_i32_0 = arith.constant 0 : i32
    %c0_i32_1 = arith.constant 0 : i32
    return %c0_i32, %c0_i32_0 : i32, i32
  }
  func.func @transform_3(%arg0: i32) -> (i32, i32) {
    %c0_i32 = arith.constant 0 : i32
    %c0_i32_0 = arith.constant 0 : i32
    %c0_i32_1 = arith.constant 0 : i32
    return %c0_i32, %c0_i32_0 : i32, i32
  }
  func.func @transform_4(%arg0: i32) -> (i32, i32) {
    %c0_i32 = arith.constant 0 : i32
    %c0_i32_0 = arith.constant 0 : i32
    %c0_i32_1 = arith.constant 0 : i32
    return %c0_i32, %c0_i32_0 : i32, i32
  }
  func.func @transform_5(%arg0: i32) -> (i32, i32) {
    %c0_i32 = arith.constant 0 : i32
    %c0_i32_0 = arith.constant 0 : i32
    %c0_i32_1 = arith.constant 0 : i32
    return %c0_i32, %c0_i32_0 : i32, i32
  }
  func.func @transform_6(%arg0: i32) -> (i32, i32) {
    %c0_i32 = arith.constant 0 : i32
    %c0_i32_0 = arith.constant 0 : i32
    %c0_i32_1 = arith.constant 0 : i32
    return %c0_i32, %c0_i32_0 : i32, i32
  }
  func.func @transform_7(%arg0: i32) -> (i32, i32) {
    %c0_i32 = arith.constant 0 : i32
    %c0_i32_0 = arith.constant 0 : i32
    %c0_i32_1 = arith.constant 0 : i32
    return %c0_i32, %c0_i32_0 : i32, i32
  }
  func.func @transform_8(%arg0: i32) -> (i32, i32) {
    %c0_i32 = arith.constant 0 : i32
    %c0_i32_0 = arith.constant 0 : i32
    %c0_i32_1 = arith.constant 0 : i32
    return %c0_i32, %c0_i32_0 : i32, i32
  }
  func.func @transform_9(%arg0: i32) -> (i32, i32) {
    %c0_i32 = arith.constant 0 : i32
    %c0_i32_0 = arith.constant 0 : i32
    %c0_i32_1 = arith.constant 0 : i32
    return %c0_i32, %c0_i32_0 : i32, i32
  }
  func.func @transform_10(%arg0: i32) -> (i32, i32) {
    %c0_i32 = arith.constant 0 : i32
    %c0_i32_0 = arith.constant 0 : i32
    %c0_i32_1 = arith.constant 0 : i32
    return %c0_i32, %c0_i32_0 : i32, i32
  }
  func.func @transform_11(%arg0: i32) -> (i32, i32) {
    %c0_i32 = arith.constant 0 : i32
    %c0_i32_0 = arith.constant 0 : i32
    %c0_i32_1 = arith.constant 0 : i32
    return %c0_i32, %c0_i32_0 : i32, i32
  }
  func.func @transform_12(%arg0: i32) -> (i32, i32) {
    %c0_i32 = arith.constant 0 : i32
    %c0_i32_0 = arith.constant 0 : i32
    %c0_i32_1 = arith.constant 0 : i32
    return %c0_i32, %c0_i32_0 : i32, i32
  }
  func.func @transform_13(%arg0: i32) -> (i32, i32) {
    %c0_i32 = arith.constant 0 : i32
    %c0_i32_0 = arith.constant 0 : i32
    %c0_i32_1 = arith.constant 0 : i32
    return %c0_i32, %c0_i32_0 : i32, i32
  }
  func.func @transform_14(%arg0: i32) -> (i32, i32) {
    %c0_i32 = arith.constant 0 : i32
    %c0_i32_0 = arith.constant 0 : i32
    %c0_i32_1 = arith.constant 0 : i32
    return %c0_i32, %c0_i32_0 : i32, i32
  }
  func.func @transform_15(%arg0: i32) -> (i32, i32) {
    %c0_i32 = arith.constant 0 : i32
    %c0_i32_0 = arith.constant 0 : i32
    %c0_i32_1 = arith.constant 0 : i32
    return %c0_i32, %c0_i32_0 : i32, i32
  }
  func.func @transform_16(%arg0: i32) -> (i32, i32) {
    %c0_i32 = arith.constant 0 : i32
    %c0_i32_0 = arith.constant 0 : i32
    return %arg0, %c0_i32 : i32, i32
  }
}

</mosaic_0001>

<bundles_post_ra>
// kernel: scc_net_forward.1
= control target key start
LH: loop header
LB: loop body
LE: loop exit
PB: predicated region body
PF: predicated region fallthrough
CT: control target
= control target key end

     0   :  { %s4458_s0 = inlined_call_operand.vmem [shape: f32[2,768], index: 0, kind: input, shape index: {}]   ;;  %s4459_s1 = inlined_call_operand.vmem [shape: f32[768,384], index: 1, kind: input, shape index: {}]   ;;  %s4460_s2 = inlined_call_operand.vmem [shape: f32[1,384], index: 2, kind: input, shape index: {}]   ;;  %s4461_s3 = inlined_call_operand.vmem [shape: f32[1,384], index: 3, kind: input, shape index: {}]   ;;  %s4462_s4 = inlined_call_operand.vmem [shape: f32[384,300], index: 4, kind: input, shape index: {}]   ;;  %s4463_s5 = inlined_call_operand.vmem [shape: f32[1,300], index: 5, kind: input, shape index: {}]   ;;  %s4464_s6 = inlined_call_operand.vmem [shape: f32[1,300], index: 6, kind: input, shape index: {}]   ;;  %s4465_s7 = inlined_call_operand.hbm [shape: f32[300,216], index: 7, kind: input, shape index: {}]   ;;  %s4466_s8 = inlined_call_operand.vmem [shape: f32[1,216], index: 8, kind: input, shape index: {}]   ;;  %s4467_s9 = inlined_call_operand.vmem [shape: f32[1,216], index: 9, kind: input, shape index: {}]   ;;  %s4468_s10 = inlined_call_operand.vmem [shape: f32[216,64], index: 10, kind: input, shape index: {}]   ;;  %s4469_s11 = inlined_call_operand.vmem [shape: f32[1,64], index: 11, kind: input, shape index: {}]   ;;  %s4470_s12 = inlined_call_operand.vmem [shape: f32[64,32], index: 12, kind: input, shape index: {}]   ;;  %s4471_s13 = inlined_call_operand.vmem [shape: f32[1,32], index: 13, kind: input, shape index: {}]   ;;  %s4472_s14 = inlined_call_operand.vmem [shape: f32[32,3], index: 14, kind: input, shape index: {}]   ;;  %s4473_s15 = inlined_call_operand.vmem [shape: f32[1,3], index: 15, kind: input, shape index: {}]   ;;  %s4474_s16 = inlined_call_operand.hbm [shape: f32[2,3], index: 16, kind: output, shape index: {}]  }
   0x1   :  { %4476 = sst [smem:[#allocation8_spill]] %s4458_s0 }
   0x2   :  { %21 = vsyncpa [#allocation3], 0 }
   0x3   :  { %22 = vsyncpa [#allocation4], 0  ;;  %s2788_s21 = smov [#allocation2]   ;;  %s2740_s25 = scalar_lea.hbm %s4465_s7, 9728 }
   0x4   :  { %s42_s22 = sshll.u32 %s2788_s21, 4  ;;  %p2741_p0 = scmp.ne.s32.totalorder %s4465_s7, %s2740_s25  ;;  %s43_s22 = int_to_ptr.vmem [resolvable:$true] %s42_s22 }
   0x5   :  { %p2744_p1 = scmp.lt.u32.totalorder %s2740_s25, %s4465_s7 }
   0x7   :  { %p2746_p2 = pnand %p2744_p1, %p2741_p0 }
   0x9   :  { %2749 = shalt.err (!%p2746_p2)
}
   0xa   :  { %s2750_s30 = scalar_lea.vmem %s43_s22, 9728  ;;  %p2755_p4 = scmp.lt.s32.totalorder %s43_s22, %s43_s22 }
   0xb   :  { %p2751_p3 = scmp.ne.s32.totalorder %s43_s22, %s2750_s30  ;;  %p2756_p5 = scmp.lt.s32.totalorder %s2750_s30, %s2750_s30 }
   0xd   :  { %p2757_p6 = por %p2756_p5, %p2755_p4 }
   0xf   :  { %p2758_p7 = pnand %p2757_p6, %p2751_p3 }
  0x11   :  { %2761 = shalt.err (!%p2758_p7)
}
  0x12   :  { %s2789_s0 = smov 256   ;;  %s2790_s17 = smov 16  }
  0x13   :  { %48 = dma.hbm_to_vmem [thread:$0]  %s4465_s7, 9728, %s43_s22, [#allocation3], %s2789_s0, %s2789_s0, %s2790_s17  }
  0x14   :  { %2784 = dma.done.wait [#allocation3], 9728  }
  0x15   :  { %2785 = vsyncadd [#allocation3], 4294957568  ;;  %v71_v0 = vld [vmem:[%s4459_s1 + $0x8] sm:$0xff]  ;;  %v74_v1 = vld [vmem:[%s4459_s1 + $0x20] sm:$0xff]  ;;  %v360_v25 = vlaneseq  ;;  %v2791_v26 = vmov 1983009808  }
  0x16   :  { %v70_v2 = vld [vmem:[%s4459_s1] sm:$0xff]  ;;  %v2135_v3 = vpack.c.bf16 %v74_v1, %v71_v0  ;;  %v73_v4 = vld [vmem:[%s4459_s1 + $0x18] sm:$0xff]  ;;  %v80_v6 = vld [vmem:[%s4459_s1 + $0x50] sm:$0xff]  ;;  %v379_v27 = vunpack.c.l.s4 %v2791_v26  ;;  %s4477_s29 = sld [smem:[#allocation8_spill]]  ;;  %vm2794_vm0 = vmmov 0   ;;  %vm1412_vm1 = vcmask 1043456  }
  0x17   :  { %v77_v5 = vld [vmem:[%s4459_s1 + $0x38] sm:$0xff]  ;;  %v2137_v7 = vpack.c.bf16 %v73_v4, %v70_v2  ;;  %v76_v9 = vld [vmem:[%s4459_s1 + $0x30] sm:$0xff]  ;;  %v79_v10 = vld [vmem:[%s4459_s1 + $0x48] sm:$0xff]  ;;  %v2960_v34 = vshrl.u32 %v360_v25, 7  ;;  %vm2795_vm2 = vmmov 1   ;;  %vm1408_vm4 = vcmask 359424  }
  0x18   :  { %v2139_v8 = vpack.c.bf16 %v80_v6, %v77_v5  ;;  %v83_v11 = vld [vmem:[%s4459_s1 + $0x68] sm:$0xff]  ;;  %2136 = vmatprep.subr.bf16.mxu0 %v2135_v3  ;;  %v86_v12 = vld [vmem:[%s4459_s1 + $0x80] sm:$0xff]  ;;  %v2141_v13 = vpack.c.bf16 %v79_v10, %v76_v9  ;;  %v85_v16 = vld [vmem:[%s4459_s1 + $0x78] sm:$0xff]  ;;  %v380_v35 = vunpack.c.0.s8 %v379_v27  ;;  %vm1611_vm5 = vcmask 719872  }
  0x19   :  { %2138 = vmatpush1.bf16.msra.mxu0 %v2137_v7  ;;  %v2143_v14 = vpack.c.bf16 %v86_v12, %v83_v11  ;;  %v82_v15 = vld [vmem:[%s4459_s1 + $0x60] sm:$0xff]  ;;  %v89_v17 = vld [vmem:[%s4459_s1 + $0x98] sm:$0xff]  ;;  %v92_v18 = vld [vmem:[%s4459_s1 + $0xb0] sm:$0xff]  ;;  %vm1701_vm6 = vcmask 523264   ;;  %vm1787_vm7 = vcmask 261120   ;;  %vm1861_vm8 = vcmask 17408  }
  0x1a   :  { %2140 = vmatprep.subr.bf16.mxu0 %v2139_v8  ;;  %v2145_v19 = vpack.c.bf16 %v85_v16, %v82_v15  ;;  %v2147_v20 = vpack.c.bf16 %v92_v18, %v89_v17  ;;  %v88_v21 = vld [vmem:[%s4459_s1 + $0x90] sm:$0xff]  ;;  %v91_v22 = vld [vmem:[%s4459_s1 + $0xa8] sm:$0xff]  ;;  %v98_v24 = vld [vmem:[%s4459_s1 + $0xe0] sm:$0xff]  ;;  %v2975_v42 = vsub.s32 %v380_v35, %v2960_v34 }
  0x1b   :  { %v95_v23 = vld [vmem:[%s4459_s1 + $0xc8] sm:$0xff]  ;;  %v2149_v28 = vpack.c.bf16 %v91_v22, %v88_v21  ;;  %v94_v30 = vld [vmem:[%s4459_s1 + $0xc0] sm:$0xff]  ;;  %v97_v31 = vld [vmem:[%s4459_s1 + $0xd8] sm:$0xff] }
  0x1c   :  { %v2151_v29 = vpack.c.bf16 %v98_v24, %v95_v23  ;;  %v101_v32 = vld [vmem:[%s4459_s1 + $0xf8] sm:$0xff]  ;;  %v104_v33 = vld [vmem:[%s4459_s1 + $0x110] sm:$0xff]  ;;  %v2153_v36 = vpack.c.bf16 %v97_v31, %v94_v30  ;;  %v103_v39 = vld [vmem:[%s4459_s1 + $0x108] sm:$0xff] }
  0x1d   :  { %2142 = vmatpush1.bf16.msra.mxu0 %v2141_v13  ;;  %v2155_v37 = vpack.c.bf16 %v104_v33, %v101_v32  ;;  %v100_v38 = vld [vmem:[%s4459_s1 + $0xf0] sm:$0xff]  ;;  %v107_v40 = vld [vmem:[%s4459_s1 + $0x128] sm:$0xff]  ;;  %v110_v41 = vld [vmem:[%s4459_s1 + $0x140] sm:$0xff] }
  0x1e   :  { %2144 = vmatprep.subr.bf16.mxu0 %v2143_v14  ;;  %v2157_v43 = vpack.c.bf16 %v103_v39, %v100_v38  ;;  %v2159_v44 = vpack.c.bf16 %v110_v41, %v107_v40  ;;  %v106_v45 = vld [vmem:[%s4459_s1 + $0x120] sm:$0xff]  ;;  %v109_v46 = vld [vmem:[%s4459_s1 + $0x138] sm:$0xff]  ;;  %v116_v49 = vld [vmem:[%s4459_s1 + $0x170] sm:$0xff] }
  0x1f   :  { %v2986_v47 = vld [vmem:[%s4477_s29] sm:$0xff]  ;;  %v113_v48 = vld [vmem:[%s4459_s1 + $0x158] sm:$0xff]  ;;  %v120_v51 = vld [vmem:[%s4459_s1 + $0x190] sm:$0xff]  ;;  %v2161_v53 = vpack.c.bf16 %v109_v46, %v106_v45 }
  0x20   :  { %v2996_v50 = vrot.slane %v2986_v47, %v2975_v42  ;;  %v123_v52 = vld [vmem:[%s4459_s1 + $0x1a8] sm:$0xff]  ;;  %v72_v56 = vld [vmem:[%s4459_s1 + $0x10] sm:$0xff]  ;;  %v2163_v58 = vpack.c.bf16 %v116_v49, %v113_v48  ;;  %v126_v62 = vld [vmem:[%s4459_s1 + $0x1c0] sm:$0xff] }
  0x21   :  { %2146 = vmatpush1.bf16.msra.mxu0 %v2145_v19  ;;  %v2327_v55 = vpack.c.bf16 %v123_v52, %v120_v51  ;;  %v75_v57 = vld [vmem:[%s4459_s1 + $0x28] sm:$0xff]  ;;  %v112_v59 = vld [vmem:[%s4459_s1 + $0x150] sm:$0xff]  ;;  %v122_v0 = vld [vmem:[%s4459_s1 + $0x1a0] sm:$0xff] }
  0x22   :  { %2148 = vmatprep.subr.bf16.mxu0 %v2147_v20  ;;  %v392_v54 = vcombine.high %v2996_v50, %v2996_v50  ;;  %v115_v60 = vld [vmem:[%s4459_s1 + $0x168] sm:$0xff]  ;;  %v2329_v61 = vpack.c.bf16 %v75_v57, %v72_v56  ;;  %v129_v1 = vld [vmem:[%s4459_s1 + $0x1d8] sm:$0xff]  ;;  %v78_v3 = vld [vmem:[%s4459_s1 + $0x40] sm:$0xff] }
  0x23   :  { %v119_v63 = vld [vmem:[%s4459_s1 + $0x188] sm:$0xff]  ;;  %2328 = vmatprep.subr.bf16.mxu1 %v2327_v55  ;;  %v2331_v2 = vpack.c.bf16 %v129_v1, %v126_v62  ;;  %v81_v4 = vld [vmem:[%s4459_s1 + $0x58] sm:$0xff]  ;;  %v2165_v5 = vpack.c.bf16 %v115_v60, %v112_v59  ;;  %v132_v7 = vld [vmem:[%s4459_s1 + $0x1f0] sm:$0xff] }
  0x24   :  { %472 = vmatprep.mubr.f32.mxu0 %v392_v54  ;;  %2330 = vmatpush3.bf16.msra.mxu1 %v2329_v61  ;;  %v2333_v6 = vpack.c.bf16 %v81_v4, %v78_v3  ;;  %v135_v8 = vld [vmem:[%s4459_s1 + $0x208] sm:$0xff]  ;;  %v2167_v9 = vpack.c.bf16 %v122_v0, %v119_v63  ;;  %v118_v10 = vld [vmem:[%s4459_s1 + $0x180] sm:$0xff]  ;;  %v121_v11 = vld [vmem:[%s4459_s1 + $0x198] sm:$0xff] }
  0x25   :  { %2150 = vmatpush1.bf16.msra.mxu0 %v2149_v28  ;;  %685 = vmatprep.mubr.f32.mxu1 %v392_v54  ;;  %v2335_v12 = vpack.c.bf16 %v135_v8, %v132_v7  ;;  %v84_v13 = vld [vmem:[%s4459_s1 + $0x70] sm:$0xff]  ;;  %v125_v14 = vld [vmem:[%s4459_s1 + $0x1b8] sm:$0xff]  ;;  %v87_v16 = vld [vmem:[%s4459_s1 + $0x88] sm:$0xff]  ;;  %v2169_v20 = vpack.c.bf16 %v121_v11, %v118_v10 }
  0x26   :  { %2152 = vmatprep.subr.bf16.mxu0 %v2151_v29  ;;  %2332 = vmatprep.subr.bf16.mxu1 %v2331_v2  ;;  %v128_v15 = vld [vmem:[%s4459_s1 + $0x1d0] sm:$0xff]  ;;  %v2337_v17 = vpack.c.bf16 %v87_v16, %v84_v13  ;;  %v138_v18 = vld [vmem:[%s4459_s1 + $0x220] sm:$0xff]  ;;  %v141_v19 = vld [vmem:[%s4459_s1 + $0x238] sm:$0xff] }
  0x27   :  { %v2339_v21 = vpack.c.bf16 %v141_v19, %v138_v18  ;;  %v90_v22 = vld [vmem:[%s4459_s1 + $0xa0] sm:$0xff]  ;;  %v93_v23 = vld [vmem:[%s4459_s1 + $0xb8] sm:$0xff]  ;;  %v2171_v24 = vpack.c.bf16 %v128_v15, %v125_v14  ;;  %v124_v25 = vld [vmem:[%s4459_s1 + $0x1b0] sm:$0xff]  ;;  %v377_v15 = vcombine.high %v2986_v47, %v2986_v47 }
  0x28   :  { %2334 = vmatpush3.bf16.msra.mxu1 %v2333_v6  ;;  %v127_v26 = vld [vmem:[%s4459_s1 + $0x1c8] sm:$0xff]  ;;  %v144_v27 = vld [vmem:[%s4459_s1 + $0x250] sm:$0xff]  ;;  %v134_v29 = vld [vmem:[%s4459_s1 + $0x200] sm:$0xff]  ;;  %v2341_v31 = vpack.c.bf16 %v93_v23, %v90_v22 }
  0x29   :  { %2154 = vmatpush1.bf16.msra.mxu0 %v2153_v36  ;;  %2336 = vmatprep.subr.bf16.mxu1 %v2335_v12  ;;  %v131_v28 = vld [vmem:[%s4459_s1 + $0x1e8] sm:$0xff]  ;;  %v2173_v32 = vpack.c.bf16 %v127_v26, %v124_v25  ;;  %v130_v33 = vld [vmem:[%s4459_s1 + $0x1e0] sm:$0xff]  ;;  %v96_v36 = vld [vmem:[%s4459_s1 + $0xd0] sm:$0xff] }
  0x2a   :  { %2156 = vmatprep.subr.bf16.mxu0 %v2155_v37  ;;  %v147_v30 = vld [vmem:[%s4459_s1 + $0x268] sm:$0xff]  ;;  %v2175_v38 = vpack.c.bf16 %v134_v29, %v131_v28  ;;  %v133_v39 = vld [vmem:[%s4459_s1 + $0x1f8] sm:$0xff]  ;;  %v150_v40 = vld [vmem:[%s4459_s1 + $0x280] sm:$0xff]  ;;  %v3207_v29 = vrot.slane %v377_v15, %v2975_v42 }
  0x2b   :  { %v2343_v35 = vpack.c.bf16 %v147_v30, %v144_v27  ;;  %v99_v37 = vld [vmem:[%s4459_s1 + $0xe8] sm:$0xff]  ;;  %v153_v41 = vld [vmem:[%s4459_s1 + $0x298] sm:$0xff]  ;;  %v2177_v46 = vpack.c.bf16 %v133_v39, %v130_v33  ;;  %v136_v48 = vld [vmem:[%s4459_s1 + $0x210] sm:$0xff] }
  0x2c   :  { %2338 = vmatpush3.bf16.msra.mxu1 %v2337_v17  ;;  %v2345_v45 = vpack.c.bf16 %v99_v37, %v96_v36  ;;  %v2347_v49 = vpack.c.bf16 %v153_v41, %v150_v40  ;;  %v102_v51 = vld [vmem:[%s4459_s1 + $0x100] sm:$0xff]  ;;  %v105_v52 = vld [vmem:[%s4459_s1 + $0x118] sm:$0xff]  ;;  %v139_v54 = vld [vmem:[%s4459_s1 + $0x228] sm:$0xff] }
  0x2d   :  { %2158 = vmatpush1.bf16.msra.mxu0 %v2157_v43  ;;  %2340 = vmatprep.subr.bf16.mxu1 %v2339_v21  ;;  %v137_v43 = vld [vmem:[%s4459_s1 + $0x218] sm:$0xff]  ;;  %v156_v55 = vld [vmem:[%s4459_s1 + $0x2b0] sm:$0xff]  ;;  %v159_v56 = vld [vmem:[%s4459_s1 + $0x2c8] sm:$0xff]  ;;  %v2349_v59 = vpack.c.bf16 %v105_v52, %v102_v51  ;;  %v2181_v60 = vpack.c.bf16 %v139_v54, %v136_v48 }
  0x2e   :  { %2160 = vmatprep.subr.bf16.mxu0 %v2159_v44  ;;  %v140_v44 = vld [vmem:[%s4459_s1 + $0x230] sm:$0xff]  ;;  %v143_v57 = vld [vmem:[%s4459_s1 + $0x248] sm:$0xff]  ;;  %v142_v61 = vld [vmem:[%s4459_s1 + $0x240] sm:$0xff]  ;;  %v2351_v62 = vpack.c.bf16 %v159_v56, %v156_v55 }
  0x2f   :  { %v108_v63 = vld [vmem:[%s4459_s1 + $0x130] sm:$0xff]  ;;  %v111_v0 = vld [vmem:[%s4459_s1 + $0x148] sm:$0xff]  ;;  %v145_v2 = vld [vmem:[%s4459_s1 + $0x258] sm:$0xff] }
  0x30   :  { %2342 = vmatpush3.bf16.msra.mxu1 %v2341_v31  ;;  %v162_v3 = vld [vmem:[%s4459_s1 + $0x2e0] sm:$0xff]  ;;  %v165_v4 = vld [vmem:[%s4459_s1 + $0x2f8] sm:$0xff]  ;;  %v152_v6 = vld [vmem:[%s4459_s1 + $0x290] sm:$0xff]  ;;  %v2353_v7 = vpack.c.bf16 %v111_v0, %v108_v63  ;;  %v2185_v8 = vpack.c.bf16 %v145_v2, %v142_v61 }
  0x31   :  { %2162 = vmatpush1.bf16.msra.mxu0 %v2161_v53  ;;  %2344 = vmatprep.subr.bf16.mxu1 %v2343_v35  ;;  %v2179_v53 = vpack.c.bf16 %v140_v44, %v137_v43  ;;  %v2355_v10 = vpack.c.bf16 %v165_v4, %v162_v3  ;;  %v114_v11 = vld [vmem:[%s4459_s1 + $0x160] sm:$0xff]  ;;  %v117_v12 = vld [vmem:[%s4459_s1 + $0x178] sm:$0xff]  ;;  %v151_v14 = vld [vmem:[%s4459_s1 + $0x288] sm:$0xff]  ;;  %v393_v43 = vcombine.high %v3207_v29, %v3207_v29 }
  0x32   :  { %2164 = vmatprep.subr.bf16.mxu0 %v2163_v58  ;;  %v146_v58 = vld [vmem:[%s4459_s1 + $0x260] sm:$0xff]  ;;  %v216_v16 = vld [vmem:[%s4459_s1 + $0x490] sm:$0xff]  ;;  %v219_v17 = vld [vmem:[%s4459_s1 + $0x4a8] sm:$0xff] }
  0x33   :  { %v2183_v1 = vpack.c.bf16 %v146_v58, %v143_v57  ;;  %v155_v18 = vld [vmem:[%s4459_s1 + $0x2a8] sm:$0xff]  ;;  %v158_v19 = vld [vmem:[%s4459_s1 + $0x2c0] sm:$0xff]  ;;  %v2359_v22 = vpack.c.bf16 %v219_v17, %v216_v16  ;;  %v168_v23 = vld [vmem:[%s4459_s1 + $0x310] sm:$0xff] }
  0x34   :  { %2346 = vmatpush3.bf16.msra.mxu1 %v2345_v45  ;;  %v154_v21 = vld [vmem:[%s4459_s1 + $0x2a0] sm:$0xff]  ;;  %v2191_v25 = vpack.c.bf16 %v158_v19, %v155_v18  ;;  %v157_v26 = vld [vmem:[%s4459_s1 + $0x2b8] sm:$0xff]  ;;  %v164_v31 = vld [vmem:[%s4459_s1 + $0x2f0] sm:$0xff] }
  0x35   :  { %2166 = vmatpush1.bf16.msra.mxu0 %v2165_v5  ;;  %2348 = vmatprep.subr.bf16.mxu1 %v2347_v49  ;;  %v149_v5 = vld [vmem:[%s4459_s1 + $0x278] sm:$0xff]  ;;  %v222_v27 = vld [vmem:[%s4459_s1 + $0x4c0] sm:$0xff]  ;;  %v2193_v33 = vpack.c.bf16 %v157_v26, %v154_v21  ;;  %v160_v35 = vld [vmem:[%s4459_s1 + $0x2d0] sm:$0xff] }
  0x36   :  { %2168 = vmatprep.subr.bf16.mxu0 %v2167_v9  ;;  %v148_v9 = vld [vmem:[%s4459_s1 + $0x270] sm:$0xff]  ;;  %v2187_v13 = vpack.c.bf16 %v152_v6, %v149_v5  ;;  %v225_v28 = vld [vmem:[%s4459_s1 + $0x4d8] sm:$0xff]  ;;  %v174_v42 = vld [vmem:[%s4459_s1 + $0x340] sm:$0xff] }
  0x37   :  { %v2189_v47 = vpack.c.bf16 %v151_v14, %v148_v9  ;;  %v161_v30 = vld [vmem:[%s4459_s1 + $0x2d8] sm:$0xff]  ;;  %v2363_v36 = vpack.c.bf16 %v225_v28, %v222_v27  ;;  %v163_v39 = vld [vmem:[%s4459_s1 + $0x2e8] sm:$0xff]  ;;  %v228_v40 = vld [vmem:[%s4459_s1 + $0x4f0] sm:$0xff] }
  0x38   :  { %2350 = vmatpush3.bf16.msra.mxu1 %v2349_v59  ;;  %v177_v37 = vld [vmem:[%s4459_s1 + $0x358] sm:$0xff]  ;;  %v231_v41 = vld [vmem:[%s4459_s1 + $0x508] sm:$0xff]  ;;  %v170_v45 = vld [vmem:[%s4459_s1 + $0x320] sm:$0xff]  ;;  %v2197_v48 = vpack.c.bf16 %v163_v39, %v160_v35 }
  0x39   :  { %2170 = vmatpush1.bf16.msra.mxu0 %v2169_v20  ;;  %2352 = vmatprep.subr.bf16.mxu1 %v2351_v62  ;;  %v2357_v20 = vpack.c.bf16 %v117_v12, %v114_v11  ;;  %v167_v44 = vld [vmem:[%s4459_s1 + $0x308] sm:$0xff]  ;;  %v166_v49 = vld [vmem:[%s4459_s1 + $0x300] sm:$0xff]  ;;  %v2367_v51 = vpack.c.bf16 %v231_v41, %v228_v40  ;;  %v180_v52 = vld [vmem:[%s4459_s1 + $0x370] sm:$0xff] }
  0x3a   :  { %2172 = vmatprep.subr.bf16.mxu0 %v2171_v24  ;;  %v171_v24 = vld [vmem:[%s4459_s1 + $0x328] sm:$0xff]  ;;  %v2199_v54 = vpack.c.bf16 %v170_v45, %v167_v44  ;;  %v169_v55 = vld [vmem:[%s4459_s1 + $0x318] sm:$0xff]  ;;  %v234_v56 = vld [vmem:[%s4459_s1 + $0x520] sm:$0xff] }
  0x3b   :  { %v237_v57 = vld [vmem:[%s4459_s1 + $0x538] sm:$0xff]  ;;  %v176_v59 = vld [vmem:[%s4459_s1 + $0x350] sm:$0xff]  ;;  %v2201_v61 = vpack.c.bf16 %v169_v55, %v166_v49  ;;  %v186_v0 = vld [vmem:[%s4459_s1 + $0x3a0] sm:$0xff] }
  0x3c   :  { %2354 = vmatpush3.bf16.msra.mxu1 %v2353_v7  ;;  %v173_v58 = vld [vmem:[%s4459_s1 + $0x338] sm:$0xff]  ;;  %v172_v62 = vld [vmem:[%s4459_s1 + $0x330] sm:$0xff]  ;;  %v2371_v63 = vpack.c.bf16 %v237_v57, %v234_v56  ;;  %v175_v3 = vld [vmem:[%s4459_s1 + $0x348] sm:$0xff] }
  0x3d   :  { %2174 = vmatpush1.bf16.msra.mxu0 %v2173_v32  ;;  %2356 = vmatprep.subr.bf16.mxu1 %v2355_v10  ;;  %v2361_v32 = vpack.c.bf16 %v171_v24, %v168_v23  ;;  %v2203_v2 = vpack.c.bf16 %v176_v59, %v173_v58  ;;  %v240_v4 = vld [vmem:[%s4459_s1 + $0x550] sm:$0xff]  ;;  %v243_v5 = vld [vmem:[%s4459_s1 + $0x568] sm:$0xff]  ;;  %v182_v7 = vld [vmem:[%s4459_s1 + $0x380] sm:$0xff]  ;;  %v2205_v9 = vpack.c.bf16 %v175_v3, %v172_v62 }
  0x3e   :  { %2176 = vmatprep.subr.bf16.mxu0 %v2175_v38  ;;  %v2195_v38 = vpack.c.bf16 %v164_v31, %v161_v30  ;;  %v179_v6 = vld [vmem:[%s4459_s1 + $0x368] sm:$0xff]  ;;  %v178_v10 = vld [vmem:[%s4459_s1 + $0x360] sm:$0xff]  ;;  %v2375_v11 = vpack.c.bf16 %v243_v5, %v240_v4  ;;  %v192_v12 = vld [vmem:[%s4459_s1 + $0x3d0] sm:$0xff] }
  0x3f   :  { %v181_v14 = vld [vmem:[%s4459_s1 + $0x378] sm:$0xff]  ;;  %v246_v15 = vld [vmem:[%s4459_s1 + $0x580] sm:$0xff]  ;;  %v188_v18 = vld [vmem:[%s4459_s1 + $0x3b0] sm:$0xff] }
  0x40   :  { %2358 = vmatpush3.bf16.msra.mxu1 %v2357_v20  ;;  %v249_v16 = vld [vmem:[%s4459_s1 + $0x598] sm:$0xff]  ;;  %v2209_v20 = vpack.c.bf16 %v181_v14, %v178_v10  ;;  %v252_v26 = vld [vmem:[%s4459_s1 + $0x5b0] sm:$0xff]  ;;  %v255_v27 = vld [vmem:[%s4459_s1 + $0x5c8] sm:$0xff] }
  0x41   :  { %2178 = vmatpush1.bf16.msra.mxu0 %v2177_v46  ;;  %2360 = vmatprep.subr.bf16.mxu1 %v2359_v22  ;;  %v2365_v46 = vpack.c.bf16 %v177_v37, %v174_v42  ;;  %v185_v17 = vld [vmem:[%s4459_s1 + $0x398] sm:$0xff]  ;;  %v2379_v21 = vpack.c.bf16 %v249_v16, %v246_v15  ;;  %v198_v22 = vld [vmem:[%s4459_s1 + $0x400] sm:$0xff]  ;;  %v191_v28 = vld [vmem:[%s4459_s1 + $0x3c8] sm:$0xff]  ;;  %v2383_v35 = vpack.c.bf16 %v255_v27, %v252_v26 }
  0x42   :  { %2180 = vmatprep.subr.bf16.mxu0 %v2179_v53  ;;  %v183_v53 = vld [vmem:[%s4459_s1 + $0x388] sm:$0xff]  ;;  %v201_v23 = vld [vmem:[%s4459_s1 + $0x418] sm:$0xff]  ;;  %v2211_v24 = vpack.c.bf16 %v188_v18, %v185_v17  ;;  %v194_v30 = vld [vmem:[%s4459_s1 + $0x3e0] sm:$0xff] }
  0x43   :  { %686 = vmatmul.mubr.f32.vlgmr.msra.gmra.mrb[0].mxu1 %v2996_v50  ;;  %v2381_v31 = vpack.c.bf16 %v201_v23, %v198_v22  ;;  %v207_v42 = vld [vmem:[%s4459_s1 + $0x448] sm:$0xff]  ;;  %v2215_v37 = vpack.c.bf16 %v194_v30, %v191_v28  ;;  %v258_v39 = vld [vmem:[%s4459_s1 + $0x5e0] sm:$0xff]  ;;  %v261_v40 = vld [vmem:[%s4459_s1 + $0x5f8] sm:$0xff] }
  0x44   :  { %2362 = vmatpush3.bf16.msra.mxu1 %v2361_v32  ;;  %755 = vmatprep.mubr.f32.mxu1 %v393_v43  ;;  %v197_v41 = vld [vmem:[%s4459_s1 + $0x3f8] sm:$0xff]  ;;  %v210_v49 = vld [vmem:[%s4459_s1 + $0x460] sm:$0xff]  ;;  %v315_v55 = vld [vmem:[%s4459_s1 + $0x7a8] sm:$0xff] }
  0x45   :  { %2182 = vmatpush1.bf16.msra.mxu0 %v2181_v60  ;;  %2364 = vmatprep.subr.bf16.mxu1 %v2363_v36  ;;  %v2369_v60 = vpack.c.bf16 %v183_v53, %v180_v52  ;;  %v204_v36 = vld [vmem:[%s4459_s1 + $0x430] sm:$0xff]  ;;  %v199_v53 = vld [vmem:[%s4459_s1 + $0x408] sm:$0xff]  ;;  %v206_v57 = vld [vmem:[%s4459_s1 + $0x440] sm:$0xff] }
  0x46   :  { %2184 = vmatprep.subr.bf16.mxu0 %v2183_v1  ;;  %v189_v1 = vld [vmem:[%s4459_s1 + $0x3b8] sm:$0xff]  ;;  %v2385_v44 = vpack.c.bf16 %v207_v42, %v204_v36  ;;  %v203_v56 = vld [vmem:[%s4459_s1 + $0x428] sm:$0xff]  ;;  %v264_v62 = vld [vmem:[%s4459_s1 + $0x610] sm:$0xff] }
  0x47   :  { %v321_v3 = vld [vmem:[%s4459_s1 + $0x7d8] sm:$0xff]  ;;  %v212_v5 = vld [vmem:[%s4459_s1 + $0x470] sm:$0xff]  ;;  %v211_v14 = vld [vmem:[%s4459_s1 + $0x468] sm:$0xff] }
  0x48   :  { %2366 = vmatpush3.bf16.msra.mxu1 %v2365_v46  ;;  %v196_v46 = vld [vmem:[%s4459_s1 + $0x3f0] sm:$0xff]  ;;  %v209_v4 = vld [vmem:[%s4459_s1 + $0x458] sm:$0xff]  ;;  %v327_v16 = vld [vmem:[%s4459_s1 + $0x808] sm:$0xff] }
  0x49   :  { %2186 = vmatpush1.bf16.msra.mxu0 %v2185_v8  ;;  %2368 = vmatprep.subr.bf16.mxu1 %v2367_v51  ;;  %v2373_v8 = vpack.c.bf16 %v189_v1, %v186_v0  ;;  %v213_v51 = vld [vmem:[%s4459_s1 + $0x478] sm:$0xff]  ;;  %v2221_v59 = vpack.c.bf16 %v199_v53, %v196_v46  ;;  %v2223_v0 = vpack.c.bf16 %v206_v57, %v203_v56  ;;  %v324_v15 = vld [vmem:[%s4459_s1 + $0x7f0] sm:$0xff]  ;;  %v215_v17 = vld [vmem:[%s4459_s1 + $0x488] sm:$0xff] }
  0x4a   :  { %2188 = vmatprep.subr.bf16.mxu0 %v2187_v13  ;;  %v195_v13 = vld [vmem:[%s4459_s1 + $0x3e8] sm:$0xff]  ;;  %v2389_v58 = vpack.c.bf16 %v213_v51, %v210_v49  ;;  %v205_v1 = vld [vmem:[%s4459_s1 + $0x438] sm:$0xff]  ;;  %v218_v18 = vld [vmem:[%s4459_s1 + $0x4a0] sm:$0xff] }
  0x4b   :  { %v2377_v19 = vpack.c.bf16 %v195_v13, %v192_v12  ;;  %v273_v12 = vld [vmem:[%s4459_s1 + $0x658] sm:$0xff]  ;;  %v276_v22 = vld [vmem:[%s4459_s1 + $0x670] sm:$0xff]  ;;  %v279_v23 = vld [vmem:[%s4459_s1 + $0x688] sm:$0xff] }
  0x4c   :  { %2370 = vmatpush3.bf16.msra.mxu1 %v2369_v60  ;;  %v202_v60 = vld [vmem:[%s4459_s1 + $0x420] sm:$0xff]  ;;  %v333_v27 = vld [vmem:[%s4459_s1 + $0x838] sm:$0xff]  ;;  %v224_v30 = vld [vmem:[%s4459_s1 + $0x4d0] sm:$0xff] }
  0x4d   :  { %2190 = vmatpush1.bf16.msra.mxu0 %v2189_v47  ;;  %2372 = vmatprep.subr.bf16.mxu1 %v2371_v63  ;;  %v184_v47 = vld [vmem:[%s4459_s1 + $0x390] sm:$0xff]  ;;  %v267_v63 = vld [vmem:[%s4459_s1 + $0x628] sm:$0xff]  ;;  %v330_v26 = vld [vmem:[%s4459_s1 + $0x820] sm:$0xff] }
  0x4e   :  { %2192 = vmatprep.subr.bf16.mxu0 %v2191_v25  ;;  %v187_v25 = vld [vmem:[%s4459_s1 + $0x3a8] sm:$0xff]  ;;  %v221_v28 = vld [vmem:[%s4459_s1 + $0x4b8] sm:$0xff]  ;;  %v282_v36 = vld [vmem:[%s4459_s1 + $0x6a0] sm:$0xff] }
  0x4f   :  { %v2213_v32 = vpack.c.bf16 %v187_v25, %v184_v47  ;;  %v214_v47 = vld [vmem:[%s4459_s1 + $0x480] sm:$0xff]  ;;  %v217_v25 = vld [vmem:[%s4459_s1 + $0x498] sm:$0xff]  ;;  %v288_v49 = vld [vmem:[%s4459_s1 + $0x6d0] sm:$0xff] }
  0x50   :  { %2374 = vmatpush3.bf16.msra.mxu1 %v2373_v8  ;;  %v2225_v8 = vpack.c.bf16 %v205_v1, %v202_v60  ;;  %v285_v42 = vld [vmem:[%s4459_s1 + $0x6b8] sm:$0xff]  ;;  %v226_v46 = vld [vmem:[%s4459_s1 + $0x4e0] sm:$0xff]  ;;  %v291_v51 = vld [vmem:[%s4459_s1 + $0x6e8] sm:$0xff] }
  0x51   :  { %2194 = vmatpush1.bf16.msra.mxu0 %v2193_v33  ;;  %2376 = vmatprep.subr.bf16.mxu1 %v2375_v11  ;;  %v190_v33 = vld [vmem:[%s4459_s1 + $0x3c0] sm:$0xff]  ;;  %v229_v53 = vld [vmem:[%s4459_s1 + $0x4f8] sm:$0xff]  ;;  %v236_v57 = vld [vmem:[%s4459_s1 + $0x530] sm:$0xff] }
  0x52   :  { %2196 = vmatprep.subr.bf16.mxu0 %v2195_v38  ;;  %v193_v38 = vld [vmem:[%s4459_s1 + $0x3d8] sm:$0xff]  ;;  %v270_v11 = vld [vmem:[%s4459_s1 + $0x640] sm:$0xff]  ;;  %v232_v60 = vld [vmem:[%s4459_s1 + $0x510] sm:$0xff] }
  0x53   :  { %v2217_v45 = vpack.c.bf16 %v193_v38, %v190_v33  ;;  %v220_v33 = vld [vmem:[%s4459_s1 + $0x4b0] sm:$0xff]  ;;  %v223_v38 = vld [vmem:[%s4459_s1 + $0x4c8] sm:$0xff]  ;;  %v233_v56 = vld [vmem:[%s4459_s1 + $0x518] sm:$0xff] }
  0x54   :  { %2378 = vmatpush3.bf16.msra.mxu1 %v2377_v19  ;;  %v2397_v19 = vpack.c.bf16 %v273_v12, %v270_v11  ;;  %v235_v1 = vld [vmem:[%s4459_s1 + $0x528] sm:$0xff]  ;;  %v300_v11 = vld [vmem:[%s4459_s1 + $0x730] sm:$0xff]  ;;  %vm2648_vm3 = vmpackc.low %vm1412_vm1, %vm2795_vm2 }
  0x55   :  { %2198 = vmatpush1.bf16.msra.mxu0 %v2197_v48  ;;  %2380 = vmatprep.subr.bf16.mxu1 %v2379_v21  ;;  %v2387_v48 = vpack.c.bf16 %v261_v40, %v258_v39  ;;  %v2399_v21 = vpack.c.bf16 %v327_v16, %v324_v15  ;;  %v336_v39 = vld [vmem:[%s4459_s1 + $0x850] sm:$0xff]  ;;  %v339_v40 = vld [vmem:[%s4459_s1 + $0x868] sm:$0xff]  ;;  %v354_v15 = vld [vmem:[%s4459_s1 + $0x8e0] sm:$0xff] }
  0x56   :  { %2200 = vmatprep.subr.bf16.mxu0 %v2199_v54  ;;  %v312_v54 = vld [vmem:[%s4459_s1 + $0x790] sm:$0xff]  ;;  %v303_v12 = vld [vmem:[%s4459_s1 + $0x748] sm:$0xff]  ;;  %v357_v16 = vld [vmem:[%s4459_s1 + $0x8f8] sm:$0xff] }
  0x58   :  { %473 = vmatmul.mubr.f32.vlgmr.msra.gmra.mrb[0].mxu0 %v2996_v50  ;;  %v2207_v50 = vpack.c.bf16 %v182_v7, %v179_v6  ;;  %2382 = vmatpush3.bf16.msra.mxu1 %v2381_v31  ;;  %v2393_v6 = vpack.c.bf16 %v267_v63, %v264_v62  ;;  %v3414_v7 = vld.sshfl [vmem:[%s4477_s29 + $0x8] sm:$0x33 pattern:$0x76325410]  ;;  %v2401_v31 = vpack.c.bf16 %v279_v23, %v276_v22  ;;  %v294_v62 = vld [vmem:[%s4459_s1 + $0x700] sm:$0xff]  ;;  %v297_v63 = vld [vmem:[%s4459_s1 + $0x718] sm:$0xff] }
  0x59   :  { %2202 = vmatpush1.bf16.msra.mxu0 %v2201_v61  ;;  %543 = vmatprep.mubr.f32.mxu0 %v393_v43  ;;  %v200_v43 = vld [vmem:[%s4459_s1 + $0x410] sm:$0xff]  ;;  %v2391_v61 = vpack.c.bf16 %v315_v55, %v312_v54  ;;  %v3427_v13 = vcombine.high %v3414_v7, %v3414_v7  ;;  %v342_v54 = vld [vmem:[%s4459_s1 + $0x880] sm:$0xff]  ;;  %v345_v55 = vld [vmem:[%s4459_s1 + $0x898] sm:$0xff] }
  0x5a   :  { %2204 = vmatprep.subr.bf16.mxu0 %v2203_v2  ;;  %2384 = vmatprep.subr.bf16.mxu1 %v2383_v35  ;;  %v2219_v52 = vpack.c.bf16 %v200_v43, %v197_v41  ;;  %v318_v2 = vld [vmem:[%s4459_s1 + $0x7c0] sm:$0xff]  ;;  %v2403_v35 = vpack.c.bf16 %v333_v27, %v330_v26  ;;  %v227_v41 = vld [vmem:[%s4459_s1 + $0x4e8] sm:$0xff]  ;;  %v309_v23 = vld [vmem:[%s4459_s1 + $0x778] sm:$0xff] }
  0x5b   :  { %v2395_v10 = vpack.c.bf16 %v321_v3, %v318_v2  ;;  %v230_v43 = vld [vmem:[%s4459_s1 + $0x500] sm:$0xff]  ;;  %v348_v2 = vld [vmem:[%s4459_s1 + $0x8b0] sm:$0xff]  ;;  %v351_v3 = vld [vmem:[%s4459_s1 + $0x8c8] sm:$0xff] }
  0x5c   :  { %2386 = vmatpush3.bf16.msra.mxu1 %v2385_v44  ;;  %v2405_v44 = vpack.c.bf16 %v285_v42, %v282_v36  ;;  %v306_v22 = vld [vmem:[%s4459_s1 + $0x760] sm:$0xff]  ;;  %v855_v26 = vld [vmem:[%s4462_s4 + $0x8] sm:$0xff]  ;;  %v857_v42 = vld [vmem:[%s4462_s4 + $0x18] sm:$0xff] }
  0x5d   :  { %2206 = vmatpush1.bf16.msra.mxu0 %v2205_v9  ;;  %2388 = vmatprep.subr.bf16.mxu1 %v2387_v48  ;;  %v208_v9 = vld [vmem:[%s4459_s1 + $0x450] sm:$0xff]  ;;  %v2407_v48 = vpack.c.bf16 %v339_v40, %v336_v39  ;;  %v858_v27 = vld [vmem:[%s4462_s4 + $0x20] sm:$0xff]  ;;  %v861_v39 = vld [vmem:[%s4462_s4 + $0x38] sm:$0xff] }
  0x5e   :  { %2208 = vmatprep.subr.bf16.mxu0 %v2207_v50  ;;  %v2227_v50 = vpack.c.bf16 %v212_v5, %v209_v4  ;;  %v239_v4 = vld [vmem:[%s4459_s1 + $0x548] sm:$0xff]  ;;  %v242_v5 = vld [vmem:[%s4459_s1 + $0x560] sm:$0xff]  ;;  %v864_v40 = vld [vmem:[%s4462_s4 + $0x50] sm:$0xff] }
  0x5f   :  { %v854_v36 = vld [vmem:[%s4462_s4] sm:$0xff] }
  0x60   :  { %2390 = vmatpush3.bf16.msra.mxu1 %v2389_v58  ;;  %v2409_v58 = vpack.c.bf16 %v291_v51, %v288_v49  ;;  %v860_v49 = vld [vmem:[%s4462_s4 + $0x30] sm:$0xff]  ;;  %v863_v51 = vld [vmem:[%s4462_s4 + $0x48] sm:$0xff] }
  0x61   :  { %2210 = vmatpush1.bf16.msra.mxu0 %v2209_v20  ;;  %2392 = vmatprep.subr.bf16.mxu1 %v2391_v61  ;;  %v2229_v20 = vpack.c.bf16 %v211_v14, %v208_v9  ;;  %v2411_v61 = vpack.c.bf16 %v345_v55, %v342_v54  ;;  %v238_v9 = vld [vmem:[%s4459_s1 + $0x540] sm:$0xff]  ;;  %v241_v14 = vld [vmem:[%s4459_s1 + $0x558] sm:$0xff]  ;;  %v867_v54 = vld [vmem:[%s4462_s4 + $0x68] sm:$0xff] }
  0x62   :  { %2212 = vmatprep.subr.bf16.mxu0 %v2211_v24  ;;  %v2231_v24 = vpack.c.bf16 %v218_v18, %v215_v17  ;;  %v245_v17 = vld [vmem:[%s4459_s1 + $0x578] sm:$0xff]  ;;  %v248_v18 = vld [vmem:[%s4459_s1 + $0x590] sm:$0xff]  ;;  %v870_v55 = vld [vmem:[%s4462_s4 + $0x80] sm:$0xff] }
  0x63   :  { %756 = vmatmul.mubr.f32.vlgmr.msra.gmra.mrb[2].mxu1 %v3207_v29 }
  0x64   :  { %2394 = vmatpush3.bf16.msra.mxu1 %v2393_v6  ;;  %825 = vmatprep.mubr.f32.mxu1 %v3427_v13  ;;  %v2413_v6 = vpack.c.bf16 %v297_v63, %v294_v62  ;;  %v869_v62 = vld [vmem:[%s4462_s4 + $0x78] sm:$0xff] }
  0x65   :  { %2214 = vmatpush1.bf16.msra.mxu0 %v2213_v32  ;;  %2396 = vmatprep.subr.bf16.mxu1 %v2395_v10  ;;  %v2233_v32 = vpack.c.bf16 %v217_v25, %v214_v47  ;;  %v2415_v10 = vpack.c.bf16 %v351_v3, %v348_v2  ;;  %v244_v47 = vld [vmem:[%s4459_s1 + $0x570] sm:$0xff]  ;;  %v247_v25 = vld [vmem:[%s4459_s1 + $0x588] sm:$0xff]  ;;  %v269_v2 = vld [vmem:[%s4459_s1 + $0x638] sm:$0xff] }
  0x66   :  { %2216 = vmatprep.subr.bf16.mxu0 %v2215_v37  ;;  %v2235_v37 = vpack.c.bf16 %v224_v30, %v221_v28  ;;  %v251_v28 = vld [vmem:[%s4459_s1 + $0x5a8] sm:$0xff]  ;;  %v254_v30 = vld [vmem:[%s4459_s1 + $0x5c0] sm:$0xff]  ;;  %v272_v3 = vld [vmem:[%s4459_s1 + $0x650] sm:$0xff] }
  0x68   :  { %2398 = vmatpush3.bf16.msra.mxu1 %v2397_v19  ;;  %v2417_v19 = vpack.c.bf16 %v303_v12, %v300_v11  ;;  %v875_v11 = vld [vmem:[%s4462_s4 + $0xa8] sm:$0xff]  ;;  %v2267_v12 = vpack.c.bf16 %v272_v3, %v269_v2  ;;  %v304_v2 = vld [vmem:[%s4459_s1 + $0x750] sm:$0xff] }
  0x69   :  { %2218 = vmatpush1.bf16.msra.mxu0 %v2217_v45  ;;  %2400 = vmatprep.subr.bf16.mxu1 %v2399_v21  ;;  %v2237_v45 = vpack.c.bf16 %v223_v38, %v220_v33  ;;  %v2419_v21 = vpack.c.bf16 %v357_v16, %v354_v15  ;;  %v250_v33 = vld [vmem:[%s4459_s1 + $0x5a0] sm:$0xff]  ;;  %v253_v38 = vld [vmem:[%s4459_s1 + $0x5b8] sm:$0xff]  ;;  %v879_v15 = vld [vmem:[%s4462_s4 + $0xc8] sm:$0xff] }
  0x6a   :  { %2220 = vmatprep.subr.bf16.mxu0 %v2219_v52  ;;  %v2239_v52 = vpack.c.bf16 %v230_v43, %v227_v41  ;;  %v257_v41 = vld [vmem:[%s4459_s1 + $0x5d8] sm:$0xff]  ;;  %v260_v43 = vld [vmem:[%s4459_s1 + $0x5f0] sm:$0xff]  ;;  %v882_v16 = vld [vmem:[%s4462_s4 + $0xe0] sm:$0xff] }
  0x6b   :  { %v307_v3 = vld [vmem:[%s4459_s1 + $0x768] sm:$0xff] }
  0x6c   :  { %2402 = vmatpush3.bf16.msra.mxu1 %v2401_v31  ;;  %v2421_v31 = vpack.c.bf16 %v309_v23, %v306_v22  ;;  %v878_v22 = vld [vmem:[%s4462_s4 + $0xc0] sm:$0xff]  ;;  %v881_v23 = vld [vmem:[%s4462_s4 + $0xd8] sm:$0xff] }
  0x6d   :  { %2222 = vmatpush1.bf16.msra.mxu0 %v2221_v59  ;;  %2404 = vmatprep.subr.bf16.mxu1 %v2403_v35  ;;  %v2241_v59 = vpack.c.bf16 %v229_v53, %v226_v46  ;;  %v2423_v35 = vpack.c.bf16 %v858_v27, %v855_v26  ;;  %v256_v46 = vld [vmem:[%s4459_s1 + $0x5d0] sm:$0xff]  ;;  %v259_v53 = vld [vmem:[%s4459_s1 + $0x5e8] sm:$0xff]  ;;  %v281_v26 = vld [vmem:[%s4459_s1 + $0x698] sm:$0xff] }
  0x6e   :  { %2224 = vmatprep.subr.bf16.mxu0 %v2223_v0  ;;  %v2243_v0 = vpack.c.bf16 %v236_v57, %v233_v56  ;;  %v263_v56 = vld [vmem:[%s4459_s1 + $0x608] sm:$0xff]  ;;  %v266_v57 = vld [vmem:[%s4459_s1 + $0x620] sm:$0xff]  ;;  %v284_v27 = vld [vmem:[%s4459_s1 + $0x6b0] sm:$0xff] }
  0x6f   :  { %v2263_v63 = vpack.c.bf16 %v266_v57, %v263_v56  ;;  %v302_v56 = vld [vmem:[%s4459_s1 + $0x740] sm:$0xff] }
  0x70   :  { %2406 = vmatpush3.bf16.msra.mxu1 %v2405_v44  ;;  %v2425_v44 = vpack.c.bf16 %v857_v42, %v854_v36  ;;  %v280_v36 = vld [vmem:[%s4459_s1 + $0x690] sm:$0xff]  ;;  %v283_v42 = vld [vmem:[%s4459_s1 + $0x6a8] sm:$0xff] }
  0x71   :  { %2226 = vmatpush1.bf16.msra.mxu0 %v2225_v8  ;;  %2408 = vmatprep.subr.bf16.mxu1 %v2407_v48  ;;  %v2245_v8 = vpack.c.bf16 %v235_v1, %v232_v60  ;;  %v2427_v48 = vpack.c.bf16 %v864_v40, %v861_v39  ;;  %v2431_v60 = vpack.c.bf16 %v870_v55, %v867_v54  ;;  %v265_v1 = vld [vmem:[%s4459_s1 + $0x618] sm:$0xff]  ;;  %v894_v54 = vld [vmem:[%s4462_s4 + $0x140] sm:$0xff]  ;;  %v299_v55 = vld [vmem:[%s4459_s1 + $0x728] sm:$0xff] }
  0x72   :  { %2228 = vmatprep.subr.bf16.mxu0 %v2227_v50  ;;  %v2247_v50 = vpack.c.bf16 %v242_v5, %v239_v4  ;;  %v873_v4 = vld [vmem:[%s4462_s4 + $0x98] sm:$0xff]  ;;  %v876_v5 = vld [vmem:[%s4462_s4 + $0xb0] sm:$0xff]  ;;  %v2277_v40 = vpack.c.bf16 %v283_v42, %v280_v36 }
  0x73   :  { %v341_v36 = vld [vmem:[%s4459_s1 + $0x878] sm:$0xff]  ;;  %v344_v42 = vld [vmem:[%s4459_s1 + $0x890] sm:$0xff] }
  0x74   :  { %2410 = vmatpush3.bf16.msra.mxu1 %v2409_v58  ;;  %v2429_v58 = vpack.c.bf16 %v863_v51, %v860_v49  ;;  %v292_v49 = vld [vmem:[%s4459_s1 + $0x6f0] sm:$0xff] }
  0x75   :  { %2230 = vmatpush1.bf16.msra.mxu0 %v2229_v20  ;;  %2412 = vmatprep.subr.bf16.mxu1 %v2411_v61  ;;  %v2249_v20 = vpack.c.bf16 %v241_v14, %v238_v9  ;;  %v866_v61 = vld [vmem:[%s4462_s4 + $0x60] sm:$0xff]  ;;  %v268_v9 = vld [vmem:[%s4459_s1 + $0x630] sm:$0xff]  ;;  %v2435_v14 = vpack.c.bf16 %v876_v5, %v873_v4  ;;  %v311_v4 = vld [vmem:[%s4459_s1 + $0x788] sm:$0xff] }
  0x76   :  { %2232 = vmatprep.subr.bf16.mxu0 %v2231_v24  ;;  %v2251_v24 = vpack.c.bf16 %v248_v18, %v245_v17  ;;  %v275_v17 = vld [vmem:[%s4459_s1 + $0x668] sm:$0xff]  ;;  %v278_v18 = vld [vmem:[%s4459_s1 + $0x680] sm:$0xff] }
  0x77   :  { %v314_v5 = vld [vmem:[%s4459_s1 + $0x7a0] sm:$0xff] }
  0x78   :  { %2414 = vmatpush3.bf16.msra.mxu1 %v2413_v6  ;;  %v2433_v6 = vpack.c.bf16 %v869_v62, %v866_v61  ;;  %v301_v61 = vld [vmem:[%s4459_s1 + $0x738] sm:$0xff] }
  0x79   :  { %2234 = vmatpush1.bf16.msra.mxu0 %v2233_v32  ;;  %2416 = vmatprep.subr.bf16.mxu1 %v2415_v10  ;;  %v2253_v32 = vpack.c.bf16 %v247_v25, %v244_v47  ;;  %v872_v10 = vld [vmem:[%s4462_s4 + $0x90] sm:$0xff]  ;;  %v274_v47 = vld [vmem:[%s4459_s1 + $0x660] sm:$0xff]  ;;  %v305_v62 = vld [vmem:[%s4459_s1 + $0x758] sm:$0xff] }
  0x7a   :  { %2236 = vmatprep.subr.bf16.mxu0 %v2235_v37  ;;  %v2255_v37 = vpack.c.bf16 %v254_v30, %v251_v28  ;;  %v888_v25 = vld [vmem:[%s4462_s4 + $0x110] sm:$0xff]  ;;  %v2441_v28 = vpack.c.bf16 %v881_v23, %v878_v22  ;;  %v329_v22 = vld [vmem:[%s4459_s1 + $0x818] sm:$0xff] }
  0x7b   :  { %v332_v23 = vld [vmem:[%s4459_s1 + $0x830] sm:$0xff] }
  0x7c   :  { %2418 = vmatpush3.bf16.msra.mxu1 %v2417_v19  ;;  %v2437_v19 = vpack.c.bf16 %v875_v11, %v872_v10  ;;  %v313_v10 = vld [vmem:[%s4459_s1 + $0x798] sm:$0xff] }
  0x7d   :  { %2238 = vmatpush1.bf16.msra.mxu0 %v2237_v45  ;;  %2420 = vmatprep.subr.bf16.mxu1 %v2419_v21  ;;  %v2257_v45 = vpack.c.bf16 %v253_v38, %v250_v33  ;;  %v2439_v21 = vpack.c.bf16 %v882_v16, %v879_v15  ;;  %v887_v33 = vld [vmem:[%s4462_s4 + $0x108] sm:$0xff]  ;;  %v290_v38 = vld [vmem:[%s4459_s1 + $0x6e0] sm:$0xff]  ;;  %v317_v11 = vld [vmem:[%s4459_s1 + $0x7b8] sm:$0xff] }
  0x7e   :  { %2240 = vmatprep.subr.bf16.mxu0 %v2239_v52  ;;  %v2259_v52 = vpack.c.bf16 %v260_v43, %v257_v41  ;;  %v286_v43 = vld [vmem:[%s4459_s1 + $0x6c0] sm:$0xff]  ;;  %v316_v15 = vld [vmem:[%s4459_s1 + $0x7b0] sm:$0xff]  ;;  %v319_v16 = vld [vmem:[%s4459_s1 + $0x7c8] sm:$0xff] }
  0x80   :  { %2422 = vmatpush3.bf16.msra.mxu1 %v2421_v31 }
  0x81   :  { %2242 = vmatpush1.bf16.msra.mxu0 %v2241_v59  ;;  %2424 = vmatprep.subr.bf16.mxu1 %v2423_v35  ;;  %v2261_v59 = vpack.c.bf16 %v259_v53, %v256_v46  ;;  %v2275_v35 = vpack.c.bf16 %v284_v27, %v281_v26  ;;  %v296_v46 = vld [vmem:[%s4459_s1 + $0x710] sm:$0xff]  ;;  %v891_v53 = vld [vmem:[%s4462_s4 + $0x128] sm:$0xff]  ;;  %v338_v27 = vld [vmem:[%s4459_s1 + $0x860] sm:$0xff] }
  0x82   :  { %2244 = vmatprep.subr.bf16.mxu0 %v2243_v0  ;;  %v262_v0 = vld [vmem:[%s4459_s1 + $0x600] sm:$0xff]  ;;  %v2447_v57 = vpack.c.bf16 %v894_v54, %v891_v53  ;;  %v335_v26 = vld [vmem:[%s4459_s1 + $0x848] sm:$0xff] }
  0x83   :  { %826 = vmatmul.mubr.f32.vlgmr.msra.gmra.mrb[4].mxu1 %v3414_v7 }
  0x84   :  { %2426 = vmatpush1.bf16.msra.mxu1 %v2425_v44  ;;  %v289_v44 = vld [vmem:[%s4459_s1 + $0x6d8] sm:$0xff] }
  0x85   :  { %2246 = vmatpush1.bf16.msra.mxu0 %v2245_v8  ;;  %2428 = vmatprep.subr.bf16.mxu1 %v2427_v48  ;;  %v2265_v8 = vpack.c.bf16 %v265_v1, %v262_v0  ;;  %v2281_v48 = vpack.c.bf16 %v289_v44, %v286_v43  ;;  %v347_v43 = vld [vmem:[%s4459_s1 + $0x8a8] sm:$0xff]  ;;  %v350_v44 = vld [vmem:[%s4459_s1 + $0x8c0] sm:$0xff] }
  0x86   :  { %2248 = vmatprep.subr.bf16.mxu0 %v2247_v50  ;;  %v271_v50 = vld [vmem:[%s4459_s1 + $0x648] sm:$0xff] }
  0x88   :  { %2430 = vmatpush1.bf16.msra.mxu1 %v2429_v58 }
  0x89   :  { %2250 = vmatpush1.bf16.msra.mxu0 %v2249_v20  ;;  %2432 = vmatprep.subr.bf16.mxu1 %v2431_v60  ;;  %v2269_v20 = vpack.c.bf16 %v271_v50, %v268_v9  ;;  %v298_v60 = vld [vmem:[%s4459_s1 + $0x720] sm:$0xff] }
  0x8a   :  { %2252 = vmatprep.subr.bf16.mxu0 %v2251_v24  ;;  %v277_v24 = vld [vmem:[%s4459_s1 + $0x678] sm:$0xff]  ;;  %v2289_v0 = vpack.c.bf16 %v301_v61, %v298_v60  ;;  %v310_v9 = vld [vmem:[%s4459_s1 + $0x780] sm:$0xff]  ;;  %v896_v60 = vld [vmem:[%s4462_s4 + $0x150] sm:$0xff] }
  0x8b   :  { %v2273_v30 = vpack.c.bf16 %v277_v24, %v274_v47  ;;  %v2297_v50 = vpack.c.bf16 %v313_v10, %v310_v9  ;;  %v322_v47 = vld [vmem:[%s4459_s1 + $0x7e0] sm:$0xff]  ;;  %v2307_v24 = vpack.c.bf16 %v332_v23, %v329_v22 }
  0x8c   :  { %2434 = vmatpush1.bf16.msra.mxu1 %v2433_v6  ;;  %v2293_v6 = vpack.c.bf16 %v307_v3, %v304_v2  ;;  %v902_v2 = vld [vmem:[%s4462_s4 + $0x180] sm:$0xff]  ;;  %v905_v3 = vld [vmem:[%s4462_s4 + $0x198] sm:$0xff] }
  0x8d   :  { %2254 = vmatpush1.bf16.msra.mxu0 %v2253_v32  ;;  %2436 = vmatprep.subr.bf16.mxu1 %v2435_v14  ;;  %v884_v32 = vld [vmem:[%s4462_s4 + $0xf0] sm:$0xff]  ;;  %v2457_v9 = vpack.c.bf16 %v905_v3, %v902_v2  ;;  %v918_v23 = vld [vmem:[%s4462_s4 + $0x200] sm:$0xff]  ;;  %v889_v2 = vld [vmem:[%s4462_s4 + $0x118] sm:$0xff] }
  0x8e   :  { %2256 = vmatprep.subr.bf16.mxu0 %v2255_v37  ;;  %v287_v37 = vld [vmem:[%s4459_s1 + $0x6c8] sm:$0xff]  ;;  %v2445_v39 = vpack.c.bf16 %v887_v33, %v884_v32  ;;  %v337_v32 = vld [vmem:[%s4459_s1 + $0x858] sm:$0xff]  ;;  %v890_v33 = vld [vmem:[%s4462_s4 + $0x120] sm:$0xff] }
  0x8f   :  { %v2279_v41 = vpack.c.bf16 %v290_v38, %v287_v37 }
  0x90   :  { %2438 = vmatpush1.bf16.msra.mxu1 %v2437_v19  ;;  %v2301_v19 = vpack.c.bf16 %v319_v16, %v316_v15  ;;  %v911_v16 = vld [vmem:[%s4462_s4 + $0x1c8] sm:$0xff] }
  0x91   :  { %2258 = vmatpush1.bf16.msra.mxu0 %v2257_v45  ;;  %2440 = vmatprep.subr.bf16.mxu1 %v2439_v21  ;;  %v293_v45 = vld [vmem:[%s4459_s1 + $0x6f8] sm:$0xff] }
  0x92   :  { %2260 = vmatprep.subr.bf16.mxu0 %v2259_v52  ;;  %v2283_v51 = vpack.c.bf16 %v296_v46, %v293_v45  ;;  %v295_v52 = vld [vmem:[%s4459_s1 + $0x708] sm:$0xff]  ;;  %v325_v21 = vld [vmem:[%s4459_s1 + $0x7f8] sm:$0xff]  ;;  %v2319_v46 = vpack.c.bf16 %v350_v44, %v347_v43 }
  0x93   :  { %v2285_v58 = vpack.c.bf16 %v295_v52, %v292_v49  ;;  %v349_v49 = vld [vmem:[%s4459_s1 + $0x8b8] sm:$0xff]  ;;  %v356_v52 = vld [vmem:[%s4459_s1 + $0x8f0] sm:$0xff]  ;;  %v923_v44 = vld [vmem:[%s4462_s4 + $0x228] sm:$0xff] }
  0x94   :  { %2442 = vmatpush1.bf16.msra.mxu1 %v2441_v28 }
  0x95   :  { %2262 = vmatpush1.bf16.msra.mxu0 %v2261_v59  ;;  %v2287_v59 = vpack.c.bf16 %v302_v56, %v299_v55  ;;  %v352_v55 = vld [vmem:[%s4459_s1 + $0x8d0] sm:$0xff]  ;;  %v355_v56 = vld [vmem:[%s4459_s1 + $0x8e8] sm:$0xff] }
  0x96   :  { %2264 = vmatprep.subr.bf16.mxu0 %v2263_v63  ;;  %v308_v63 = vld [vmem:[%s4459_s1 + $0x770] sm:$0xff] }
  0x97   :  { %v2291_v1 = vpack.c.bf16 %v308_v63, %v305_v62  ;;  %v899_v62 = vld [vmem:[%s4462_s4 + $0x168] sm:$0xff]  ;;  %v906_v63 = vld [vmem:[%s4462_s4 + $0x1a0] sm:$0xff] }
  0x98   :  { %544 = vmatmul.mubr.f32.vlgmr.msra.gmra.mrb[0].mxu0 %v3207_v29  ;;  %v2271_v29 = vpack.c.bf16 %v278_v18, %v275_v17  ;;  %v323_v17 = vld [vmem:[%s4459_s1 + $0x7e8] sm:$0xff]  ;;  %v326_v18 = vld [vmem:[%s4459_s1 + $0x800] sm:$0xff] }
  0x99   :  { %2266 = vmatpush1.bf16.msra.mxu0 %v2265_v8  ;;  %614 = vmatprep.mubr.f32.mxu0 %v3427_v13  ;;  %v885_v13 = vld [vmem:[%s4462_s4 + $0xf8] sm:$0xff]  ;;  %v2295_v8 = vpack.c.bf16 %v314_v5, %v311_v4  ;;  %v904_v4 = vld [vmem:[%s4462_s4 + $0x190] sm:$0xff]  ;;  %v907_v5 = vld [vmem:[%s4462_s4 + $0x1a8] sm:$0xff] }
  0x9a   :  { %2268 = vmatprep.subr.bf16.mxu0 %v2267_v12  ;;  %v2443_v31 = vpack.c.bf16 %v888_v25, %v885_v13  ;;  %v320_v12 = vld [vmem:[%s4459_s1 + $0x7d0] sm:$0xff]  ;;  %v331_v25 = vld [vmem:[%s4459_s1 + $0x828] sm:$0xff]  ;;  %v2519_v10 = vpack.c.bf16 %v907_v5, %v904_v4 }
  0x9b   :  { %v2299_v14 = vpack.c.bf16 %v320_v12, %v317_v11  ;;  %v328_v13 = vld [vmem:[%s4459_s1 + $0x810] sm:$0xff]  ;;  %v909_v12 = vld [vmem:[%s4462_s4 + $0x1b8] sm:$0xff]  ;;  %v935_v5 = vld [vmem:[%s4462_s4 + $0x288] sm:$0xff] }
  0x9c   :  { %2444 = vmatprep.subr.bf16.mxu1 %v2443_v31  ;;  %v2309_v28 = vpack.c.bf16 %v331_v25, %v328_v13  ;;  %v2311_v31 = vpack.c.bf16 %v338_v27, %v335_v26  ;;  %v919_v13 = vld [vmem:[%s4462_s4 + $0x208] sm:$0xff]  ;;  %v868_v25 = vld [vmem:[%s4462_s4 + $0x70] sm:$0xff]  ;;  %v914_v27 = vld [vmem:[%s4462_s4 + $0x1e0] sm:$0xff] }
  0x9d   :  { %2270 = vmatpush1.bf16.msra.mxu0 %v2269_v20  ;;  %2446 = vmatpush1.bf16.msra.mxu1 %v2445_v39  ;;  %v2303_v20 = vpack.c.bf16 %v326_v18, %v323_v17  ;;  %v2315_v39 = vpack.c.bf16 %v344_v42, %v341_v36  ;;  %v910_v17 = vld [vmem:[%s4462_s4 + $0x1c0] sm:$0xff]  ;;  %v913_v18 = vld [vmem:[%s4462_s4 + $0x1d8] sm:$0xff]  ;;  %v932_v4 = vld [vmem:[%s4462_s4 + $0x270] sm:$0xff] }
  0x9e   :  { %2272 = vmatprep.subr.bf16.mxu0 %v2271_v29  ;;  %2448 = vmatprep.subr.bf16.mxu1 %v2447_v57  ;;  %v2305_v29 = vpack.c.bf16 %v325_v21, %v322_v47  ;;  %v2325_v57 = vpack.c.bf16 %v355_v56, %v352_v55  ;;  %v865_v47 = vld [vmem:[%s4462_s4 + $0x58] sm:$0xff]  ;;  %v915_v21 = vld [vmem:[%s4462_s4 + $0x1e8] sm:$0xff]  ;;  %v880_v55 = vld [vmem:[%s4462_s4 + $0xd0] sm:$0xff] }
  0x9f   :  { %v2463_v26 = vpack.c.bf16 %v918_v23, %v915_v21  ;;  %v925_v42 = vld [vmem:[%s4462_s4 + $0x238] sm:$0xff]  ;;  %v883_v56 = vld [vmem:[%s4462_s4 + $0xe8] sm:$0xff] }
  0xa0   :  { %v945_v23 = vld [vmem:[%s4462_s4 + $0x2d8] sm:$0xff] }
  0xa1   :  { %2274 = vmatpush1.bf16.msra.mxu0 %v2273_v30  ;;  %v334_v30 = vld [vmem:[%s4459_s1 + $0x840] sm:$0xff] }
  0xa2   :  { %2276 = vmatprep.subr.bf16.mxu0 %v2275_v35  ;;  %v893_v35 = vld [vmem:[%s4462_s4 + $0x138] sm:$0xff]  ;;  %v2313_v38 = vpack.c.bf16 %v337_v32, %v334_v30 }
  0xa3   :  { %v2449_v37 = vpack.c.bf16 %v893_v35, %v890_v33  ;;  %v921_v32 = vld [vmem:[%s4462_s4 + $0x218] sm:$0xff]  ;;  %v924_v33 = vld [vmem:[%s4462_s4 + $0x230] sm:$0xff]  ;;  %v922_v35 = vld [vmem:[%s4462_s4 + $0x220] sm:$0xff] }
  0xa4   :  { %v2467_v43 = vpack.c.bf16 %v924_v33, %v921_v32 }
  0xa5   :  { %2278 = vmatpush1.bf16.msra.mxu0 %v2277_v40  ;;  %2450 = vmatpush1.bf16.msra.mxu1 %v2449_v37  ;;  %v340_v40 = vld [vmem:[%s4459_s1 + $0x870] sm:$0xff] }
  0xa6   :  { %2280 = vmatprep.subr.bf16.mxu0 %v2279_v41  ;;  %v343_v41 = vld [vmem:[%s4459_s1 + $0x888] sm:$0xff] }
  0xa7   :  { %v2317_v45 = vpack.c.bf16 %v343_v41, %v340_v40  ;;  %v874_v40 = vld [vmem:[%s4462_s4 + $0xa0] sm:$0xff]  ;;  %v877_v41 = vld [vmem:[%s4462_s4 + $0xb8] sm:$0xff] }
  0xa9   :  { %2282 = vmatpush1.bf16.msra.mxu0 %v2281_v48  ;;  %v346_v48 = vld [vmem:[%s4459_s1 + $0x8a0] sm:$0xff] }
  0xaa   :  { %2284 = vmatprep.subr.bf16.mxu0 %v2283_v51  ;;  %v353_v51 = vld [vmem:[%s4459_s1 + $0x8d8] sm:$0xff]  ;;  %v2321_v53 = vpack.c.bf16 %v349_v49, %v346_v48  ;;  %v927_v48 = vld [vmem:[%s4462_s4 + $0x248] sm:$0xff]  ;;  %v930_v49 = vld [vmem:[%s4462_s4 + $0x260] sm:$0xff] }
  0xab   :  { %v2323_v54 = vpack.c.bf16 %v356_v52, %v353_v51  ;;  %v2533_v51 = vpack.c.bf16 %v877_v41, %v874_v40 }
  0xad   :  { %2286 = vmatpush1.bf16.msra.mxu0 %v2285_v58  ;;  %v897_v58 = vld [vmem:[%s4462_s4 + $0x158] sm:$0xff] }
  0xae   :  { %2288 = vmatprep.subr.bf16.mxu0 %v2287_v59  ;;  %v900_v59 = vld [vmem:[%s4462_s4 + $0x170] sm:$0xff] }
  0xaf   :  { %v2451_v61 = vpack.c.bf16 %v900_v59, %v897_v58  ;;  %v929_v58 = vld [vmem:[%s4462_s4 + $0x258] sm:$0xff]  ;;  %v934_v59 = vld [vmem:[%s4462_s4 + $0x280] sm:$0xff] }
  0xb1   :  { %2290 = vmatpush1.bf16.msra.mxu0 %v2289_v0  ;;  %v2453_v0 = vpack.c.bf16 %v899_v62, %v896_v60  ;;  %2452 = vmatprep.subr.bf16.mxu1 %v2451_v61  ;;  %v937_v60 = vld [vmem:[%s4462_s4 + $0x298] sm:$0xff]  ;;  %v936_v62 = vld [vmem:[%s4462_s4 + $0x290] sm:$0xff] }
  0xb2   :  { %2292 = vmatprep.subr.bf16.mxu0 %v2291_v1  ;;  %v933_v61 = vld [vmem:[%s4462_s4 + $0x278] sm:$0xff] }
  0xb3   :  { %2454 = vmatpush1.bf16.msra.mxu1 %v2453_v0  ;;  %v2539_v0 = vpack.c.bf16 %v937_v60, %v934_v59  ;;  %v2475_v3 = vpack.c.bf16 %v936_v62, %v933_v61  ;;  %v4112_v60 = vld [vmem:[%s4461_s3] sm:$0x7] }
  0xb5   :  { %2294 = vmatpush1.bf16.msra.mxu0 %v2293_v6  ;;  %v856_v6 = vld [vmem:[%s4462_s4 + $0x10] sm:$0xff] }
  0xb6   :  { %2296 = vmatprep.subr.bf16.mxu0 %v2295_v8  ;;  %v859_v8 = vld [vmem:[%s4462_s4 + $0x28] sm:$0xff] }
  0xb7   :  { %v2521_v11 = vpack.c.bf16 %v859_v8, %v856_v6  ;;  %v2477_v8 = vpack.c.bf16 %v935_v5, %v932_v4  ;;  %v960_v5 = vld [vmem:[%s4462_s4 + $0x350] sm:$0xff] }
  0xb9   :  { %2298 = vmatpush1.bf16.msra.mxu0 %v2297_v50  ;;  %v912_v50 = vld [vmem:[%s4462_s4 + $0x1d0] sm:$0xff] }
  0xba   :  { %2300 = vmatprep.subr.bf16.mxu0 %v2299_v14  ;;  %v908_v14 = vld [vmem:[%s4462_s4 + $0x1b0] sm:$0xff]  ;;  %v2459_v15 = vpack.c.bf16 %v912_v50, %v909_v12  ;;  %v939_v12 = vld [vmem:[%s4462_s4 + $0x2a8] sm:$0xff]  ;;  %v942_v50 = vld [vmem:[%s4462_s4 + $0x2c0] sm:$0xff] }
  0xbd   :  { %2302 = vmatpush1.bf16.msra.mxu0 %v2301_v19  ;;  %v2523_v19 = vpack.c.bf16 %v913_v18, %v910_v17  ;;  %v940_v17 = vld [vmem:[%s4462_s4 + $0x2b0] sm:$0xff] }
  0xbe   :  { %2304 = vmatprep.subr.bf16.mxu0 %v2303_v20  ;;  %v862_v20 = vld [vmem:[%s4462_s4 + $0x40] sm:$0xff] }
  0xbf   :  { %v2525_v22 = vpack.c.bf16 %v865_v47, %v862_v20  ;;  %v892_v20 = vld [vmem:[%s4462_s4 + $0x130] sm:$0xff]  ;;  %v895_v47 = vld [vmem:[%s4462_s4 + $0x148] sm:$0xff] }
  0xc1   :  { %2306 = vmatpush1.bf16.msra.mxu0 %v2305_v29  ;;  %v2461_v29 = vpack.c.bf16 %v911_v16, %v908_v14  ;;  %v2479_v14 = vpack.c.bf16 %v942_v50, %v939_v12  ;;  %v941_v16 = vld [vmem:[%s4462_s4 + $0x2b8] sm:$0xff] }
  0xc2   :  { %2308 = vmatprep.subr.bf16.mxu0 %v2307_v24  ;;  %v916_v24 = vld [vmem:[%s4462_s4 + $0x1f0] sm:$0xff] }
  0xc3   :  { %v2527_v30 = vpack.c.bf16 %v919_v13, %v916_v24  ;;  %v944_v13 = vld [vmem:[%s4462_s4 + $0x2d0] sm:$0xff] }
  0xc5   :  { %2310 = vmatpush1.bf16.msra.mxu0 %v2309_v28  ;;  %v917_v28 = vld [vmem:[%s4462_s4 + $0x1f8] sm:$0xff] }
  0xc6   :  { %2312 = vmatprep.subr.bf16.mxu0 %v2311_v31  ;;  %v871_v31 = vld [vmem:[%s4462_s4 + $0x88] sm:$0xff]  ;;  %v2465_v37 = vpack.c.bf16 %v917_v28, %v914_v27  ;;  %v949_v28 = vld [vmem:[%s4462_s4 + $0x2f8] sm:$0xff] }
  0xc7   :  { %v2529_v36 = vpack.c.bf16 %v871_v31, %v868_v25  ;;  %v947_v25 = vld [vmem:[%s4462_s4 + $0x2e8] sm:$0xff]  ;;  %v901_v31 = vld [vmem:[%s4462_s4 + $0x178] sm:$0xff] }
  0xc8   :  { %v2485_v27 = vpack.c.bf16 %v947_v25, %v944_v13  ;;  %v962_v25 = vld [vmem:[%s4462_s4 + $0x360] sm:$0xff] }
  0xc9   :  { %2314 = vmatpush1.bf16.msra.mxu0 %v2313_v38  ;;  %v920_v38 = vld [vmem:[%s4462_s4 + $0x210] sm:$0xff] }
  0xca   :  { %2316 = vmatprep.subr.bf16.mxu0 %v2315_v39  ;;  %v2531_v39 = vpack.c.bf16 %v925_v42, %v922_v35  ;;  %v2469_v52 = vpack.c.bf16 %v923_v44, %v920_v38  ;;  %v951_v35 = vld [vmem:[%s4462_s4 + $0x308] sm:$0xff]  ;;  %v358_v38 = vld [vmem:[%s4460_s2] sm:$0x7] }
  0xcd   :  { %2318 = vmatpush1.bf16.msra.mxu0 %v2317_v45  ;;  %v928_v45 = vld [vmem:[%s4462_s4 + $0x250] sm:$0xff] }
  0xce   :  { %2320 = vmatprep.subr.bf16.mxu0 %v2319_v46  ;;  %v931_v46 = vld [vmem:[%s4462_s4 + $0x268] sm:$0xff] }
  0xd1   :  { %2322 = vmatpush1.bf16.msra.mxu0 %v2321_v53  ;;  %v926_v53 = vld [vmem:[%s4462_s4 + $0x240] sm:$0xff] }
  0xd2   :  { %2324 = vmatprep.subr.bf16.mxu0 %v2323_v54  ;;  %v2535_v54 = vpack.c.bf16 %v931_v46, %v928_v45 }
  0xd5   :  { %2326 = vmatpush1.bf16.msra.mxu0 %v2325_v57  ;;  %v2471_v57 = vpack.c.bf16 %v930_v49, %v927_v48 }
  0xd6   :  { %2520 = vmatprep.subr.bf16.mxu0 %v2519_v10 }
  0xd8   :  { %615 = vmatmul.mubr.f32.vlgmr.msra.gmra.mrb[0].mxu0 %v3414_v7  ;;  %v903_v7 = vld [vmem:[%s4462_s4 + $0x188] sm:$0xff] }
  0xd9   :  { %v2455_v1 = vpack.c.bf16 %v906_v63, %v903_v7  ;;  %2522 = vmatpush3.bf16.msra.mxu0 %v2521_v11  ;;  %v2537_v7 = vpack.c.bf16 %v883_v56, %v880_v55  ;;  %v2473_v63 = vpack.c.bf16 %v929_v58, %v926_v53  ;;  %v1323_v53 = vld [vmem:[#allocation2 + $0x18] sm:$0xff]  ;;  %v4102_v55 = vsub.s32 0, %v2960_v34 }
  0xda   :  { %2524 = vmatprep.subr.bf16.mxu0 %v2523_v19  ;;  %v943_v19 = vld [vmem:[%s4462_s4 + $0x2c8] sm:$0xff]  ;;  %v4105_v56 = vsub.s32 1, %v2960_v34 }
  0xdb   :  { %2456 = vmatprep.subr.bf16.mxu1 %v2455_v1  ;;  %v886_v1 = vld [vmem:[%s4462_s4 + $0x100] sm:$0xff]  ;;  %v2543_v21 = vpack.c.bf16 %v943_v19, %v940_v17  ;;  %v963_v17 = vld [vmem:[%s4462_s4 + $0x368] sm:$0xff] }
  0xdc   :  { %2458 = vmatpush1.bf16.msra.mxu1 %v2457_v9  ;;  %v2541_v6 = vpack.c.bf16 %v889_v2, %v886_v1  ;;  %v367_v58 = vrot.slane %v358_v38, %v4105_v56  ;;  %v950_v1 = vld [vmem:[%s4462_s4 + $0x300] sm:$0xff]  ;;  %v953_v2 = vld [vmem:[%s4462_s4 + $0x318] sm:$0xff] }
  0xdd   :  { %2460 = vmatprep.subr.bf16.mxu1 %v2459_v15  ;;  %2526 = vmatpush3.bf16.msra.mxu0 %v2525_v22  ;;  %v938_v15 = vld [vmem:[%s4462_s4 + $0x2a0] sm:$0xff]  ;;  %v2545_v22 = vpack.c.bf16 %v895_v47, %v892_v20  ;;  %v2489_v12 = vpack.c.bf16 %v953_v2, %v950_v1  ;;  %v1343_v1 = vld [vmem:[#allocation2 + $0xb8] sm:$0xff] }
  0xde   :  { %2528 = vmatprep.subr.bf16.mxu0 %v2527_v30  ;;  %v2481_v18 = vpack.c.bf16 %v941_v16, %v938_v15  ;;  %v898_v30 = vld [vmem:[%s4462_s4 + $0x160] sm:$0xff]  ;;  %v956_v15 = vld [vmem:[%s4462_s4 + $0x330] sm:$0xff]  ;;  %v959_v16 = vld [vmem:[%s4462_s4 + $0x348] sm:$0xff] }
  0xdf   :  { %v2549_v33 = vpack.c.bf16 %v901_v31, %v898_v30  ;;  %v966_v19 = vld [vmem:[%s4462_s4 + $0x380] sm:$0xff]  ;;  %v972_v30 = vld [vmem:[%s4462_s4 + $0x3b0] sm:$0xff] }
  0xe0   :  { %2462 = vmatpush1.bf16.msra.mxu1 %v2461_v29  ;;  %v948_v29 = vld [vmem:[%s4462_s4 + $0x2f0] sm:$0xff]  ;;  %v1324_v47 = vld [vmem:[#allocation2 + $0x20] sm:$0xff]  ;;  %v2495_v13 = vpack.c.bf16 %v966_v19, %v963_v17 }
  0xe1   :  { %2464 = vmatprep.subr.bf16.mxu1 %v2463_v26  ;;  %2530 = vmatpush3.bf16.msra.mxu0 %v2529_v36  ;;  %v2483_v24 = vpack.c.bf16 %v948_v29, %v945_v23  ;;  %v946_v26 = vld [vmem:[%s4462_s4 + $0x2e0] sm:$0xff]  ;;  %v1331_v23 = vld [vmem:[#allocation2 + $0x58] sm:$0xff]  ;;  %v2493_v29 = vpack.c.bf16 %v959_v16, %v956_v15  ;;  %v996_v19 = vld [vmem:[%s4462_s4 + $0x470] sm:$0xff] }
  0xe2   :  { %2532 = vmatprep.subr.bf16.mxu0 %v2531_v39  ;;  %v2547_v32 = vpack.c.bf16 %v949_v28, %v946_v26  ;;  %v954_v36 = vld [vmem:[%s4462_s4 + $0x320] sm:$0xff]  ;;  %v965_v26 = vld [vmem:[%s4462_s4 + $0x378] sm:$0xff] }
  0xe3   :  { %v2487_v42 = vpack.c.bf16 %v954_v36, %v951_v35  ;;  %v1333_v35 = vld [vmem:[#allocation2 + $0x68] sm:$0xff]  ;;  %v1335_v36 = vld [vmem:[#allocation2 + $0x78] sm:$0xff]  ;;  %v986_v15 = vld [vmem:[%s4462_s4 + $0x420] sm:$0xff] }
  0xe4   :  { %2466 = vmatpush1.bf16.msra.mxu1 %v2465_v37  ;;  %v4093_v37 = vsub.s32 2, %v2960_v34  ;;  %v839_v34 = vrot.slane %v4112_v60, %v4102_v55  ;;  %v989_v16 = vld [vmem:[%s4462_s4 + $0x438] sm:$0xff] }
  0xe5   :  { %2468 = vmatprep.subr.bf16.mxu1 %v2467_v43  ;;  %2534 = vmatpush3.bf16.msra.mxu0 %v2533_v51 }
  0xe6   :  { %2536 = vmatprep.subr.bf16.mxu0 %v2535_v54  ;;  %v371_v39 = vrot.slane %v358_v38, %v4093_v37 }
  0xe8   :  { %2470 = vmatpush1.bf16.msra.mxu1 %v2469_v52  ;;  %v1321_v52 = vld [vmem:[#allocation2 + $0x8] sm:$0xff] }
  0xe9   :  { %2472 = vmatprep.subr.bf16.mxu1 %v2471_v57  ;;  %2538 = vmatpush3.bf16.msra.mxu0 %v2537_v7  ;;  %v2575_v54 = vpack.c.bf16 %v1323_v53, %v1321_v52  ;;  %v363_v57 = vrot.slane %v358_v38, %v4102_v55  ;;  %v1339_v52 = vld [vmem:[#allocation2 + $0x98] sm:$0xff] }
  0xea   :  { %2540 = vmatprep.subr.bf16.mxu0 %v2539_v0 }
  0xec   :  { %2474 = vmatpush1.bf16.msra.mxu1 %v2473_v63  ;;  %v843_v63 = vrot.slane %v4112_v60, %v4105_v56 }
  0xed   :  { %2476 = vmatprep.subr.bf16.mxu1 %v2475_v3  ;;  %2542 = vmatpush3.bf16.msra.mxu0 %v2541_v6  ;;  %v957_v3 = vld [vmem:[%s4462_s4 + $0x338] sm:$0xff]  ;;  %v1320_v6 = vld [vmem:[#allocation2] sm:$0xff] }
  0xee   :  { %2544 = vmatprep.subr.bf16.mxu0 %v2543_v21  ;;  %v1326_v21 = vld [vmem:[#allocation2 + $0x30] sm:$0xff] }
  0xef   :  { %v2581_v28 = vpack.c.bf16 %v1326_v21, %v1324_v47  ;;  %v992_v21 = vld [vmem:[%s4462_s4 + $0x450] sm:$0xff] }
  0xf0   :  { %2478 = vmatpush1.bf16.msra.mxu1 %v2477_v8  ;;  %v1322_v8 = vld [vmem:[#allocation2 + $0x10] sm:$0xff] }
  0xf1   :  { %2480 = vmatprep.subr.bf16.mxu1 %v2479_v14  ;;  %2546 = vmatpush3.bf16.msra.mxu0 %v2545_v22  ;;  %v2491_v14 = vpack.c.bf16 %v960_v5, %v957_v3  ;;  %v1329_v22 = vld [vmem:[#allocation2 + $0x48] sm:$0xff] }
  0xf2   :  { %2548 = vmatprep.subr.bf16.mxu0 %v2547_v32  ;;  %v2583_v31 = vpack.c.bf16 %v1331_v23, %v1329_v22  ;;  %v1328_v32 = vld [vmem:[#allocation2 + $0x40] sm:$0xff]  ;;  %v983_v5 = vld [vmem:[%s4462_s4 + $0x408] sm:$0xff] }
  0xf3   :  { %v995_v22 = vld [vmem:[%s4462_s4 + $0x468] sm:$0xff] }
  0xf4   :  { %2482 = vmatpush1.bf16.msra.mxu1 %v2481_v18  ;;  %v2577_v18 = vpack.c.bf16 %v1322_v8, %v1320_v6  ;;  %v987_v6 = vld [vmem:[%s4462_s4 + $0x428] sm:$0xff]  ;;  %v2517_v23 = vpack.c.bf16 %v995_v22, %v992_v21  ;;  %v1367_v22 = vld [vmem:[#allocation2 + $0x178] sm:$0xff] }
  0xf5   :  { %2484 = vmatprep.subr.bf16.mxu1 %v2483_v24  ;;  %2550 = vmatpush3.bf16.msra.mxu0 %v2549_v33  ;;  %v2792_v24 = vmov 0.0   ;;  %v1330_v33 = vld [vmem:[#allocation2 + $0x50] sm:$0xff]  ;;  %v1365_v21 = vld [vmem:[#allocation2 + $0x168] sm:$0xff] }
  0xf6   :  { %2576 = vmatprep.subr.bf16.mxu0 %v2575_v54 }
  0xf8   :  { %2486 = vmatpush1.bf16.msra.mxu1 %v2485_v27  ;;  %v969_v27 = vld [vmem:[%s4462_s4 + $0x398] sm:$0xff] }
  0xf9   :  { %2488 = vmatprep.subr.bf16.mxu1 %v2487_v42  ;;  %v2497_v42 = vpack.c.bf16 %v965_v26, %v962_v25  ;;  %v2499_v38 = vpack.c.bf16 %v972_v30, %v969_v27  ;;  %v952_v25 = vld [vmem:[%s4462_s4 + $0x310] sm:$0xff]  ;;  %v955_v26 = vld [vmem:[%s4462_s4 + $0x328] sm:$0xff]  ;;  %v2793_v30 = vmov 0.0|0.0  }
  0xfa   :  { %v2552_v27 = vpack.c.bf16 %v955_v26, %v952_v25  ;;  %v1366_v25 = vld [vmem:[#allocation2 + $0x170] sm:$0xff]  ;;  %v1369_v26 = vld [vmem:[#allocation2 + $0x188] sm:$0xff] }
 0x116   :  { %v1931_v9 = vpop.f32.mrb[0].mxu1 }
 0x117   :  { %v1932_v10 = vpop.f32.mrb[1].mxu1 }
 0x118   :  { %v1933_v11 = vadd.f32 %v1932_v10, %v1931_v9  ;;  %v1325_v9 = vld [vmem:[#allocation2 + $0x28] sm:$0xff]  ;;  %v1327_v10 = vld [vmem:[#allocation2 + $0x38] sm:$0xff] }
 0x119   :  { %v2579_v20 = vpack.c.bf16 %v1327_v10, %v1325_v9  ;;  %v990_v9 = vld [vmem:[%s4462_s4 + $0x440] sm:$0xff] }
 0x11a   :  { %v688_v40 = vadd.f32 %v1933_v11, %v371_v39  ;;  %v968_v39 = vld [vmem:[%s4462_s4 + $0x390] sm:$0xff] }
 0x136   :  { %v1966_v41 = vpop.f32.mrb[2].mxu1 }
 0x137   :  { %v1967_v43 = vpop.f32.mrb[3].mxu1 }
 0x138   :  { %v1968_v44 = vadd.f32 %v1967_v43, %v1966_v41  ;;  %v975_v41 = vld [vmem:[%s4462_s4 + $0x3c8] sm:$0xff]  ;;  %v2585_v43 = vpack.c.bf16 %v1330_v33, %v1328_v32  ;;  %v964_v32 = vld [vmem:[%s4462_s4 + $0x370] sm:$0xff] }
 0x139   :  { %v967_v33 = vld [vmem:[%s4462_s4 + $0x388] sm:$0xff] }
 0x13a   :  { %v758_v45 = vadd.f32 %v1968_v44, %v688_v40  ;;  %v971_v40 = vld [vmem:[%s4462_s4 + $0x3a8] sm:$0xff]  ;;  %v978_v44 = vld [vmem:[%s4462_s4 + $0x3e0] sm:$0xff] }
 0x13b   :  { %v2501_v53 = vpack.c.bf16 %v971_v40, %v968_v39  ;;  %v2503_v54 = vpack.c.bf16 %v978_v44, %v975_v41  ;;  %v976_v39 = vld [vmem:[%s4462_s4 + $0x3d0] sm:$0xff]  ;;  %v979_v40 = vld [vmem:[%s4462_s4 + $0x3e8] sm:$0xff]  ;;  %v985_v44 = vld [vmem:[%s4462_s4 + $0x418] sm:$0xff] }
 0x13c   :  { %v2564_v41 = vpack.c.bf16 %v979_v40, %v976_v39  ;;  %v1377_v40 = vld [vmem:[#allocation2 + $0x1c8] sm:$0xff] }
 0x156   :  { %v2001_v46 = vpop.f32.mrb[4].mxu1 }
 0x157   :  { %v2002_v48 = vpop.f32.mrb[5].mxu1 }
 0x158   :  { %v2003_v49 = vadd.f32 %v2002_v48, %v2001_v46  ;;  %v1332_v46 = vld [vmem:[#allocation2 + $0x60] sm:$0xff]  ;;  %v1334_v48 = vld [vmem:[#allocation2 + $0x70] sm:$0xff] }
 0x15a   :  { %v4099_v51 = vadd.f32 %v2003_v49, %v758_v45  ;;  %v2587_v45 = vpack.c.bf16 %v1335_v36, %v1333_v35  ;;  %v1337_v49 = vld [vmem:[#allocation2 + $0x88] sm:$0xff]  ;;  %v2558_v35 = vpack.c.bf16 %v967_v33, %v964_v32  ;;  %v970_v36 = vld [vmem:[%s4462_s4 + $0x3a0] sm:$0xff]  ;;  %v1375_v33 = vld [vmem:[#allocation2 + $0x1b8] sm:$0xff] }
 0x15b   :  { %v1373_v32 = vld [vmem:[#allocation2 + $0x1a8] sm:$0xff] }
 0x1ab   :  { %v616_v59 = vpop.f32.mrb[0].mxu0 }
 0x1ac   :  { %v2710_v61 = vadd.f32 %v616_v59, %v363_v57  ;;  %v618_v62 = vpop.f32.mrb[1].mxu0  ;;  %v974_v57 = vld [vmem:[%s4462_s4 + $0x3c0] sm:$0xff]  ;;  %v981_v59 = vld [vmem:[%s4462_s4 + $0x3f8] sm:$0xff] }
 0x1ad   :  { %v2711_v7 = vadd.f32 %v618_v62, %v367_v58  ;;  %v977_v58 = vld [vmem:[%s4462_s4 + $0x3d8] sm:$0xff]  ;;  %v984_v62 = vld [vmem:[%s4462_s4 + $0x410] sm:$0xff] }
 0x1ae   :  { %v831_v0 = vmax.f32 %v2710_v61, 0.0  ;;  %v2589_v61 = vpack.c.bf16 %v1334_v48, %v1332_v46  ;;  %v2505_v2 = vpack.c.bf16 %v977_v58, %v974_v57  ;;  %v2507_v3 = vpack.c.bf16 %v984_v62, %v981_v59  ;;  %v988_v46 = vld [vmem:[%s4462_s4 + $0x430] sm:$0xff]  ;;  %v991_v48 = vld [vmem:[%s4462_s4 + $0x448] sm:$0xff]  ;;  %v1347_v58 = vld [vmem:[#allocation2 + $0xd8] sm:$0xff] }
 0x1af   :  { %v832_v4 = vmax.f32 %v2711_v7, 0.0  ;;  %v2591_v7 = vpack.c.bf16 %v1339_v52, %v1337_v49  ;;  %v2570_v49 = vpack.c.bf16 %v991_v48, %v988_v46  ;;  %v994_v52 = vld [vmem:[%s4462_s4 + $0x460] sm:$0xff]  ;;  %v1345_v57 = vld [vmem:[#allocation2 + $0xc8] sm:$0xff]  ;;  %v1346_v62 = vld [vmem:[#allocation2 + $0xd0] sm:$0xff] }
 0x1b0   :  { %v851_v50 = vadd.f32 %v839_v34, %v831_v0  ;;  %v1338_v0 = vld [vmem:[#allocation2 + $0x90] sm:$0xff]  ;;  %v1341_v34 = vld [vmem:[#allocation2 + $0xa8] sm:$0xff]  ;;  %v2599_v59 = vpack.c.bf16 %v1347_v58, %v1345_v57 }
 0x1b1   :  { %v852_v11 = vadd.f32 %v843_v63, %v832_v4  ;;  %v1336_v63 = vld [vmem:[#allocation2 + $0x80] sm:$0xff]  ;;  %v980_v4 = vld [vmem:[%s4462_s4 + $0x3f0] sm:$0xff]  ;;  %v2595_v10 = vpack.c.bf16 %v1343_v1, %v1341_v34  ;;  %v1381_v48 = vld [vmem:[#allocation2 + $0x1e8] sm:$0xff] }
 0x1b2   :  { %v2593_v8 = vpack.c.bf16 %v1338_v0, %v1336_v63  ;;  %v1349_v63 = vld [vmem:[#allocation2 + $0xe8] sm:$0xff]  ;;  %v1351_v0 = vld [vmem:[#allocation2 + $0xf8] sm:$0xff]  ;;  %v1348_v34 = vld [vmem:[#allocation2 + $0xe0] sm:$0xff] }
 0x1b3   :  { %1079 = vmatprep.mubr.f32.mxu1 %v852_v11  ;;  %1221 = vmatprep.mubr.f32.mxu0 %v852_v11  ;;  %v1340_v11 = vld [vmem:[#allocation2 + $0xa0] sm:$0xff]  ;;  %v2603_v1 = vpack.c.bf16 %v1351_v0, %v1349_v63  ;;  %v1385_v58 = vld [vmem:[#allocation2 + $0x208] sm:$0xff]  ;;  %v1579_v63 = vld [vmem:[%s4468_s10 + $0x10] sm:$0xff] }
 0x1b4   :  { %1080 = vmatmul.mubr.f32.vlgmr.msra.gmra.mrb[6].mxu1 %v851_v50  ;;  %1222 = vmatmul.mubr.f32.vlgmr.msra.gmra.mrb[2].mxu0 %v851_v50  ;;  %v2509_v50 = vpack.c.bf16 %v983_v5, %v980_v4  ;;  %v1355_v4 = vld [vmem:[#allocation2 + $0x118] sm:$0xff] }
 0x1b5   :  { %2490 = vmatpush1.bf16.msra.mxu1 %v2489_v12  ;;  %1150 = vmatprep.mubr.f32.mxu1 %v2792_v24  ;;  %v1342_v12 = vld [vmem:[#allocation2 + $0xb0] sm:$0xff] }
 0x1b6   :  { %2492 = vmatprep.subr.bf16.mxu1 %v2491_v14  ;;  %2578 = vmatpush1.bf16.msra.mxu0 %v2577_v18  ;;  %v2511_v14 = vpack.c.bf16 %v990_v9, %v987_v6  ;;  %v2597_v17 = vpack.c.bf16 %v1342_v12, %v1340_v11  ;;  %v993_v18 = vld [vmem:[%s4462_s4 + $0x458] sm:$0xff]  ;;  %v1354_v9 = vld [vmem:[#allocation2 + $0x110] sm:$0xff] }
 0x1b7   :  { %2580 = vmatprep.subr.bf16.mxu0 %v2579_v20  ;;  %v2513_v20 = vpack.c.bf16 %v989_v16, %v986_v15  ;;  %v2515_v47 = vpack.c.bf16 %v996_v19, %v993_v18  ;;  %v1359_v11 = vld [vmem:[#allocation2 + $0x138] sm:$0xff]  ;;  %v1358_v15 = vld [vmem:[#allocation2 + $0x130] sm:$0xff]  ;;  %v1361_v16 = vld [vmem:[#allocation2 + $0x148] sm:$0xff] }
 0x1b9   :  { %2494 = vmatpush1.bf16.msra.mxu1 %v2493_v29  ;;  %v833_v29 = vmax.f32 %v4099_v51, 0.0  ;;  %v958_v51 = vld [vmem:[%s4462_s4 + $0x340] sm:$0xff] }
 0x1ba   :  { %2496 = vmatprep.subr.bf16.mxu1 %v2495_v13  ;;  %2582 = vmatpush1.bf16.msra.mxu0 %v2581_v28  ;;  %v847_v13 = vrot.slane %v4112_v60, %v4093_v37  ;;  %v961_v60 = vld [vmem:[%s4462_s4 + $0x358] sm:$0xff] }
 0x1bb   :  { %2584 = vmatprep.subr.bf16.mxu0 %v2583_v31  ;;  %v2555_v31 = vpack.c.bf16 %v961_v60, %v958_v51  ;;  %v1368_v60 = vld [vmem:[#allocation2 + $0x180] sm:$0xff] }
 0x1bc   :  { %v853_v28 = vadd.f32 %v847_v13, %v833_v29  ;;  %v2619_v29 = vpack.c.bf16 %v1367_v22, %v1365_v21  ;;  %v1364_v13 = vld [vmem:[#allocation2 + $0x160] sm:$0xff]  ;;  %v1594_v21 = vld [vmem:[%s4468_s10 + $0x88] sm:$0xff] }
 0x1bd   :  { %2498 = vmatpush1.bf16.msra.mxu1 %v2497_v42  ;;  %v973_v42 = vld [vmem:[%s4462_s4 + $0x3b8] sm:$0xff] }
 0x1be   :  { %2500 = vmatprep.subr.bf16.mxu1 %v2499_v38  ;;  %2586 = vmatpush1.bf16.msra.mxu0 %v2585_v43  ;;  %v2561_v38 = vpack.c.bf16 %v973_v42, %v970_v36  ;;  %v982_v43 = vld [vmem:[%s4462_s4 + $0x400] sm:$0xff]  ;;  %v2627_v36 = vpack.c.bf16 %v1375_v33, %v1373_v32 }
 0x1bf   :  { %2588 = vmatprep.subr.bf16.mxu0 %v2587_v45  ;;  %v2567_v45 = vpack.c.bf16 %v985_v44, %v982_v43  ;;  %v1372_v42 = vld [vmem:[#allocation2 + $0x1a0] sm:$0xff] }
 0x1c0   :  { %v1376_v44 = vld [vmem:[#allocation2 + $0x1c0] sm:$0xff] }
 0x1c1   :  { %2502 = vmatpush1.bf16.msra.mxu1 %v2501_v53  ;;  %v997_v53 = vld [vmem:[%s4462_s4 + $0x478] sm:$0xff] }
 0x1c2   :  { %2504 = vmatprep.subr.bf16.mxu1 %v2503_v54  ;;  %2590 = vmatpush1.bf16.msra.mxu0 %v2589_v61  ;;  %v2573_v54 = vpack.c.bf16 %v997_v53, %v994_v52  ;;  %v1344_v61 = vld [vmem:[#allocation2 + $0xc0] sm:$0xff] }
 0x1c3   :  { %2592 = vmatprep.subr.bf16.mxu0 %v2591_v7  ;;  %v2601_v7 = vpack.c.bf16 %v1346_v62, %v1344_v61  ;;  %v1380_v53 = vld [vmem:[#allocation2 + $0x1e0] sm:$0xff] }
 0x1c4   :  { %v1577_v62 = vld [vmem:[%s4468_s10] sm:$0xff] }
 0x1c5   :  { %2506 = vmatpush1.bf16.msra.mxu1 %v2505_v2  ;;  %v1350_v2 = vld [vmem:[#allocation2 + $0xf0] sm:$0xff] }
 0x1c6   :  { %2508 = vmatprep.subr.bf16.mxu1 %v2507_v3  ;;  %2594 = vmatpush1.bf16.msra.mxu0 %v2593_v8  ;;  %v1353_v3 = vld [vmem:[#allocation2 + $0x108] sm:$0xff]  ;;  %v2605_v5 = vpack.c.bf16 %v1350_v2, %v1348_v34  ;;  %v1352_v8 = vld [vmem:[#allocation2 + $0x100] sm:$0xff]  ;;  %v1580_v34 = vld [vmem:[%s4468_s10 + $0x18] sm:$0xff] }
 0x1c7   :  { %2596 = vmatprep.subr.bf16.mxu0 %v2595_v10  ;;  %v2607_v6 = vpack.c.bf16 %v1355_v4, %v1353_v3  ;;  %v1357_v10 = vld [vmem:[#allocation2 + $0x128] sm:$0xff]  ;;  %v2609_v12 = vpack.c.bf16 %v1354_v9, %v1352_v8  ;;  %v1581_v2 = vld [vmem:[%s4468_s10 + $0x20] sm:$0xff] }
 0x1c8   :  { %v1582_v3 = vld [vmem:[%s4468_s10 + $0x28] sm:$0xff]  ;;  %v1585_v9 = vld [vmem:[%s4468_s10 + $0x40] sm:$0xff] }
 0x1c9   :  { %2510 = vmatpush1.bf16.msra.mxu1 %v2509_v50  ;;  %v2611_v50 = vpack.c.bf16 %v1359_v11, %v1357_v10  ;;  %v2660_v4 = vpack.c.bf16 %v1582_v3, %v1581_v2  ;;  %v1586_v10 = vld [vmem:[%s4468_s10 + $0x48] sm:$0xff] }
 0x1ca   :  { %2512 = vmatprep.subr.bf16.mxu1 %v2511_v14  ;;  %2598 = vmatpush1.bf16.msra.mxu0 %v2597_v17  ;;  %v1356_v14 = vld [vmem:[#allocation2 + $0x120] sm:$0xff]  ;;  %v1363_v17 = vld [vmem:[#allocation2 + $0x158] sm:$0xff]  ;;  %v2666_v11 = vpack.c.bf16 %v1586_v10, %v1585_v9 }
 0x1cb   :  { %2600 = vmatprep.subr.bf16.mxu0 %v2599_v59  ;;  %v2613_v18 = vpack.c.bf16 %v1358_v15, %v1356_v14  ;;  %v2615_v19 = vpack.c.bf16 %v1363_v17, %v1361_v16  ;;  %v1387_v59 = vld [vmem:[#allocation2 + $0x218] sm:$0xff]  ;;  %v1589_v15 = vld [vmem:[%s4468_s10 + $0x60] sm:$0xff]  ;;  %v1590_v16 = vld [vmem:[%s4468_s10 + $0x68] sm:$0xff] }
 0x1cc   :  { %v2639_v61 = vpack.c.bf16 %v1387_v59, %v1385_v58  ;;  %v2672_v17 = vpack.c.bf16 %v1590_v16, %v1589_v15  ;;  %v1388_v58 = vld [vmem:[#allocation2 + $0x220] sm:$0xff]  ;;  %v1390_v59 = vld [vmem:[#allocation2 + $0x230] sm:$0xff] }
 0x1cd   :  { %2514 = vmatpush1.bf16.msra.mxu1 %v2513_v20  ;;  %v1360_v20 = vld [vmem:[#allocation2 + $0x140] sm:$0xff]  ;;  %v1603_v16 = vld [vmem:[%s4468_s10 + $0xd0] sm:$0xff] }
 0x1ce   :  { %2516 = vmatprep.subr.bf16.mxu1 %v2515_v47  ;;  %2602 = vmatpush1.bf16.msra.mxu0 %v2601_v7  ;;  %v1362_v47 = vld [vmem:[#allocation2 + $0x150] sm:$0xff]  ;;  %v1578_v7 = vld [vmem:[%s4468_s10 + $0x8] sm:$0xff] }
 0x1cf   :  { %2604 = vmatprep.subr.bf16.mxu0 %v2603_v1  ;;  %v2654_v0 = vpack.c.bf16 %v1578_v7, %v1577_v62  ;;  %v2657_v1 = vpack.c.bf16 %v1580_v34, %v1579_v63  ;;  %v1395_v62 = vld [vmem:[#allocation2 + $0x258] sm:$0xf]  ;;  %v2645_v7 = vpack.c.bf16 %v1390_v59, %v1388_v58  ;;  %v1394_v34 = vld [vmem:[#allocation2 + $0x250] sm:$0xf] }
 0x1d1   :  { %2518 = vmatpush1.bf16.msra.mxu1 %v2517_v23  ;;  %v2617_v23 = vpack.c.bf16 %v1362_v47, %v1360_v20  ;;  %v1593_v47 = vld [vmem:[%s4468_s10 + $0x80] sm:$0xff] }
 0x1d2   :  { %2551 = vmatprep.subr.bf16.mxu1 %v2793_v30  ;;  %2606 = vmatpush1.bf16.msra.mxu0 %v2605_v5  ;;  %v1583_v5 = vld [vmem:[%s4468_s10 + $0x30] sm:$0xff]  ;;  %v2678_v22 = vpack.c.bf16 %v1594_v21, %v1593_v47 }
 0x1d3   :  { %2608 = vmatprep.subr.bf16.mxu0 %v2607_v6  ;;  %v1584_v6 = vld [vmem:[%s4468_s10 + $0x38] sm:$0xff] }
 0x1d4   :  { %1151 = vmatmul.mubr.f32.vlgmr.msra.gmra.mrb[6].mxu1 %v853_v28  ;;  %v2663_v8 = vpack.c.bf16 %v1584_v6, %v1583_v5 }
 0x1d5   :  { %2553 = vmatpush3.bf16.msra.mxu1 %v2552_v27  ;;  %2102 = vmatprep.mubr.msk.f32.mxu1 %vm2794_vm0, %v2792_v24  ;;  %v1371_v27 = vld [vmem:[#allocation2 + $0x198] sm:$0xff] }
 0x1d6   :  { %2554 = vmatprep.subr.bf16.mxu1 %v2793_v30  ;;  %2610 = vmatpush1.bf16.msra.mxu0 %v2609_v12  ;;  %v2623_v51 = vpack.c.bf16 %v1371_v27, %v1369_v26  ;;  %v1587_v12 = vld [vmem:[%s4468_s10 + $0x50] sm:$0xff]  ;;  %v1598_v26 = vld [vmem:[%s4468_s10 + $0xa8] sm:$0xff] }
 0x1d7   :  { %2612 = vmatprep.subr.bf16.mxu0 %v2611_v50  ;;  %v1588_v50 = vld [vmem:[%s4468_s10 + $0x58] sm:$0xff] }
 0x1d8   :  { %v2669_v14 = vpack.c.bf16 %v1588_v50, %v1587_v12  ;;  %v1600_v12 = vld [vmem:[%s4468_s10 + $0xb8] sm:$0xff] }
 0x1d9   :  { %2556 = vmatpush3.bf16.msra.mxu1 %v2555_v31  ;;  %v1370_v31 = vld [vmem:[#allocation2 + $0x190] sm:$0xff] }
 0x1da   :  { %2557 = vmatprep.subr.bf16.mxu1 %v2793_v30  ;;  %2614 = vmatpush1.bf16.msra.mxu0 %v2613_v18  ;;  %v1591_v18 = vld [vmem:[%s4468_s10 + $0x70] sm:$0xff] }
 0x1db   :  { %2616 = vmatprep.subr.bf16.mxu0 %v2615_v19  ;;  %v1592_v19 = vld [vmem:[%s4468_s10 + $0x78] sm:$0xff] }
 0x1dc   :  { %v2675_v20 = vpack.c.bf16 %v1592_v19, %v1591_v18 }
 0x1dd   :  { %2559 = vmatpush3.bf16.msra.mxu1 %v2558_v35  ;;  %v2625_v35 = vpack.c.bf16 %v1370_v31, %v1368_v60  ;;  %v998_v31 = vld [vmem:[%s4463_s5] sm:$0x7] }
 0x1de   :  { %2560 = vmatprep.subr.bf16.mxu1 %v2793_v30  ;;  %2618 = vmatpush1.bf16.msra.mxu0 %v2617_v23  ;;  %v1595_v23 = vld [vmem:[%s4468_s10 + $0x90] sm:$0xff]  ;;  %v1003_v32 = vrot.slane %v998_v31, %v4102_v55  ;;  %v1007_v33 = vrot.slane %v998_v31, %v4105_v56  ;;  %v1011_v2 = vrot.slane %v998_v31, %v4093_v37 }
 0x1df   :  { %2620 = vmatprep.subr.bf16.mxu0 %v2619_v29  ;;  %v1596_v29 = vld [vmem:[%s4468_s10 + $0x98] sm:$0xff] }
 0x1e1   :  { %2562 = vmatpush3.bf16.msra.mxu1 %v2561_v38  ;;  %v1374_v38 = vld [vmem:[#allocation2 + $0x1b0] sm:$0xff] }
 0x1e2   :  { %2563 = vmatprep.subr.bf16.mxu1 %v2793_v30  ;;  %v2629_v39 = vpack.c.bf16 %v1374_v38, %v1372_v42 }
 0x1e5   :  { %2565 = vmatpush3.bf16.msra.mxu1 %v2564_v41  ;;  %v1379_v41 = vld [vmem:[#allocation2 + $0x1d8] sm:$0xff] }
 0x1e6   :  { %2566 = vmatprep.subr.bf16.mxu1 %v2793_v30  ;;  %v2631_v43 = vpack.c.bf16 %v1379_v41, %v1377_v40 }
 0x1e9   :  { %2568 = vmatpush3.bf16.msra.mxu1 %v2567_v45  ;;  %v1378_v45 = vld [vmem:[#allocation2 + $0x1d0] sm:$0xff] }
 0x1ea   :  { %2569 = vmatprep.subr.bf16.mxu1 %v2793_v30  ;;  %v2633_v46 = vpack.c.bf16 %v1378_v45, %v1376_v44  ;;  %v1384_v44 = vld [vmem:[#allocation2 + $0x200] sm:$0xff]  ;;  %v1386_v45 = vld [vmem:[#allocation2 + $0x210] sm:$0xff] }
 0x1ed   :  { %2571 = vmatpush3.bf16.msra.mxu1 %v2570_v49  ;;  %v1383_v49 = vld [vmem:[#allocation2 + $0x1f8] sm:$0xff] }
 0x1ee   :  { %2572 = vmatprep.subr.bf16.mxu1 %v2793_v30  ;;  %v2635_v52 = vpack.c.bf16 %v1383_v49, %v1381_v48  ;;  %v1389_v48 = vld [vmem:[#allocation2 + $0x228] sm:$0xff]  ;;  %v1391_v49 = vld [vmem:[#allocation2 + $0x238] sm:$0xff] }
 0x1f1   :  { %2574 = vmatpush3.bf16.msra.mxu1 %v2573_v54  ;;  %v1382_v54 = vld [vmem:[#allocation2 + $0x1f0] sm:$0xff] }
 0x1f2   :  { %2653 = vmatprep.subr.bf16.mxu1 %v2793_v30  ;;  %v2637_v57 = vpack.c.bf16 %v1382_v54, %v1380_v53  ;;  %v2641_v53 = vpack.c.bf16 %v1386_v45, %v1384_v44 }
 0x1f4   :  { %2103 = vmatmul.mubr.f32.vlgmr.msra.gmra.mrb[8].mxu1 %v853_v28  ;;  %v2621_v28 = vpack.c.bf16 %v1366_v25, %v1364_v13  ;;  %v2681_v13 = vpack.c.bf16 %v1596_v29, %v1595_v23  ;;  %v1597_v25 = vld [vmem:[%s4468_s10 + $0xa0] sm:$0xff] }
 0x1f5   :  { %2655 = vmatpush1.bf16.msra.mxu1 %v2654_v0  ;;  %v2684_v27 = vpack.c.bf16 %v1598_v26, %v1597_v25  ;;  %v1392_v0 = vld [vmem:[#allocation2 + $0x240] sm:$0xff] }
 0x1f6   :  { %2622 = vmatpush1.bf16.msra.mxu0 %v2621_v28  ;;  %2656 = vmatprep.subr.bf16.mxu1 %v2793_v30  ;;  %v1686_v26 = vld [vmem:[%s4470_s12] sm:$0xff] }
 0x1f7   :  { %2624 = vmatprep.subr.bf16.mxu0 %v2623_v51 }
 0x1f9   :  { %2658 = vmatpush1.bf16.msra.mxu1 %v2657_v1  ;;  %v2650_v1 = vpack.c.bf16 %v1394_v34, %v1392_v0 }
 0x1fa   :  { %2626 = vmatpush1.bf16.msra.mxu0 %v2625_v35  ;;  %2659 = vmatprep.subr.bf16.mxu1 %v2793_v30  ;;  %v1300_v35 = vld [vmem:[%s4464_s6] sm:$0x7] }
 0x1fb   :  { %2628 = vmatprep.subr.bf16.mxu0 %v2627_v36  ;;  %v1309_v40 = vrot.slane %v1300_v35, %v4105_v56  ;;  %v1313_v6 = vrot.slane %v1300_v35, %v4093_v37  ;;  %v1601_v37 = vld [vmem:[%s4468_s10 + $0xc0] sm:$0xff] }
 0x1fd   :  { %2661 = vmatpush1.bf16.msra.mxu1 %v2660_v4 }
 0x1fe   :  { %2630 = vmatpush1.bf16.msra.mxu0 %v2629_v39  ;;  %2662 = vmatprep.subr.bf16.mxu1 %v2793_v30 }
 0x1ff   :  { %2632 = vmatprep.subr.bf16.mxu0 %v2631_v43  ;;  %v1305_v43 = vrot.slane %v1300_v35, %v4102_v55  ;;  %v1691_v35 = vld [vmem:[%s4470_s12 + $0x28] sm:$0xff] }
 0x201   :  { %2664 = vmatpush1.bf16.msra.mxu1 %v2663_v8 }
 0x202   :  { %2634 = vmatpush1.bf16.msra.mxu0 %v2633_v46  ;;  %2665 = vmatprep.subr.bf16.mxu1 %v2793_v30 }
 0x203   :  { %2636 = vmatprep.subr.bf16.mxu0 %v2635_v52 }
 0x205   :  { %2667 = vmatpush1.bf16.msra.mxu1 %v2666_v11  ;;  %v1599_v11 = vld [vmem:[%s4468_s10 + $0xb0] sm:$0xff] }
 0x206   :  { %2638 = vmatpush1.bf16.msra.mxu0 %v2637_v57  ;;  %2668 = vmatprep.subr.bf16.mxu1 %v2793_v30  ;;  %v2643_v57 = vpack.c.bf16 %v1391_v49, %v1389_v48  ;;  %v2687_v50 = vpack.c.bf16 %v1600_v12, %v1599_v11  ;;  %v1777_v48 = vld [vmem:[%s4472_s14 + $0x8] sm:$0xff]  ;;  %v1778_v49 = vld [vmem:[%s4472_s14 + $0x10] sm:$0xff] }
 0x207   :  { %2640 = vmatprep.subr.bf16.mxu0 %v2639_v61  ;;  %v1393_v61 = vld [vmem:[#allocation2 + $0x248] sm:$0xff] }
 0x208   :  { %v2647_v63 = vpack.c.bf16 %v1395_v62, %v1393_v61  ;;  %v1897_v62 = vld [vmem:[%s4473_s15] ss:$0 sm:$0xff] }
 0x209   :  { %2670 = vmatpush1.bf16.msra.mxu1 %v2669_v14  ;;  %v1602_v14 = vld [vmem:[%s4468_s10 + $0xc8] sm:$0xff] }
 0x20a   :  { %2671 = vmatprep.subr.bf16.mxu1 %v2793_v30  ;;  %v2690_v15 = vpack.c.bf16 %v1602_v14, %v1601_v37 }
 0x20d   :  { %2673 = vmatpush1.bf16.msra.mxu1 %v2672_v17  ;;  %v1396_v17 = vld [vmem:[%s4466_s8] sm:$0x3] }
 0x20e   :  { %2674 = vmatprep.subr.bf16.mxu1 %v2793_v30  ;;  %v1401_v18 = vrot.slane %v1396_v17, %v4102_v55  ;;  %v1405_v19 = vrot.slane %v1396_v17, %v4105_v56 }
 0x211   :  { %2676 = vmatpush1.bf16.msra.mxu1 %v2675_v20  ;;  %v1563_v20 = vld [vmem:[%s4467_s9] sm:$0x3] }
 0x212   :  { %2677 = vmatprep.subr.bf16.mxu1 %v2793_v30  ;;  %v1572_v29 = vrot.slane %v1563_v20, %v4105_v56  ;;  %v1568_v25 = vrot.slane %v1563_v20, %v4102_v55  ;;  %v1688_v56 = vld [vmem:[%s4470_s12 + $0x10] sm:$0xff]  ;;  %v1689_v55 = vld [vmem:[%s4470_s12 + $0x18] sm:$0xff] }
 0x215   :  { %2679 = vmatpush1.bf16.msra.mxu1 %v2678_v22 }
 0x216   :  { %2680 = vmatprep.subr.bf16.mxu1 %v2793_v30 }
 0x219   :  { %2682 = vmatpush1.bf16.msra.mxu1 %v2681_v13 }
 0x21a   :  { %2683 = vmatprep.subr.bf16.mxu1 %v2793_v30 }
 0x21d   :  { %2685 = vmatpush1.bf16.msra.mxu1 %v2684_v27  ;;  %v1687_v27 = vld [vmem:[%s4470_s12 + $0x8] sm:$0xff] }
 0x21e   :  { %2686 = vmatprep.subr.bf16.mxu1 %v2793_v30 }
 0x221   :  { %2688 = vmatpush1.bf16.msra.mxu1 %v2687_v50 }
 0x222   :  { %2689 = vmatprep.subr.bf16.mxu1 %v2793_v30 }
 0x225   :  { %2691 = vmatpush1.bf16.msra.mxu1 %v2690_v15 }
 0x226   :  { %1667 = vmatprep.subr.mxu1 %v2792_v24 }
 0x229   :  { %1668 = vmatpush1.msra.mxu1 %v1603_v16 }
 0x22a   :  { %2692 = vmatprep.subr.bf16.mxu1 %v2793_v30 }
 0x287   :  { %v2036_v28 = vpop.f32.mrb[2].mxu0 }
 0x288   :  { %v2037_v51 = vpop.f32.mrb[3].mxu0 }
 0x289   :  { %v2038_v60 = vadd.f32 %v2037_v51, %v2036_v28 }
 0x28b   :  { %v1224_v3 = vadd.f32 %v2038_v60, %v1011_v2  ;;  %v2693_v60 = vpack.c.bf16 %v1687_v27, %v1686_v26 }
 0x2a7   :  { %v1152_v36 = vpop.f32.mrb[6].mxu1 }
 0x2a8   :  { %v2712_v42 = vadd.f32 %v1152_v36, %v1003_v32  ;;  %v1154_v38 = vpop.f32.mrb[7].mxu1  ;;  %v2696_v32 = vpack.c.bf16 %v1689_v55, %v1688_v56 }
 0x2a9   :  { %v2713_v39 = vadd.f32 %v1154_v38, %v1007_v33  ;;  %v1690_v33 = vld [vmem:[%s4470_s12 + $0x20] sm:$0xff]  ;;  %v1693_v38 = vld [vmem:[%s4470_s12 + $0x38] sm:$0xff] }
 0x2aa   :  { %v1297_v41 = vmax.f32 %v2712_v42, 0.0  ;;  %v2699_v36 = vpack.c.bf16 %v1691_v35, %v1690_v33  ;;  %v1692_v42 = vld [vmem:[%s4470_s12 + $0x30] sm:$0xff] }
 0x2ab   :  { %v1298_v46 = vmax.f32 %v2713_v39, 0.0  ;;  %v2702_v39 = vpack.c.bf16 %v1693_v38, %v1692_v42 }
 0x2ac   :  { %v1317_v54 = vadd.f32 %v1305_v43, %v1297_v41 }
 0x2ad   :  { %v1318_v52 = vadd.f32 %v1309_v40, %v1298_v46  ;;  %v1893_v40 = vld [vmem:[%s4469_s11] ss:$0 sm:$0xff] }
 0x2ae   :  { %v1776_v46 = vld [vmem:[%s4472_s14] sm:$0xff] }
 0x2af   :  { %1483 = vmatprep.mubr.f32.mxu0 %v1318_v52  ;;  %v2705_v52 = vpack.c.bf16 %v1777_v48, %v1776_v46 }
 0x2b0   :  { %1484 = vmatmul.mubr.f32.vlgmr.msra.gmra.mrb[4].mxu0 %v1317_v54 }
 0x2b1   :  { %2642 = vmatpush1.bf16.msra.mxu0 %v2641_v53  ;;  %1554 = vmatprep.mubr.f32.mxu0 %v2792_v24  ;;  %v1779_v53 = vld [vmem:[%s4472_s14 + $0x18] sm:$0xff] }
 0x2b2   :  { %2644 = vmatprep.subr.bf16.mxu0 %v2643_v57  ;;  %v2708_v54 = vpack.c.bf16 %v1779_v53, %v1778_v49 }
 0x2b5   :  { %2646 = vmatpush1.bf16.msra.mxu0 %v2645_v7 }
 0x2b6   :  { %2649 = vmatprep.subr.msk.bf16.mxu0 %vm2648_vm3, %v2647_v63 }
 0x2b9   :  { %2652 = vmatpush1.bf16.msk.msra.mxu0 %vm2648_vm3, %v2650_v1 }
 0x2c7   :  { %v1293_v4 = vpop.f32.mrb[8].mxu1 }
 0x2c8   :  { %v1294_v5 = vadd.f32 %v1293_v4, %v1224_v3  ;;  %v2104_v8 = vpop.f32.mrb[9].mxu1 }
 0x2ca   :  { %v1299_v9 = vmax.f32 %v1294_v5, 0.0 }
 0x2cc   :  { %v1319_v10 = vadd.f32 %v1313_v6, %v1299_v9 }
 0x2ce   :  { %1892 = vmatmul.mubr.msk.f32.vlgmr.msra.gmra.mrb[4].mxu0 %vm1408_vm4, %v1319_v10 }
 0x3a1   :  { %v1556_v47 = vpop.f32.mrb[4].mxu0 }
 0x3a2   :  { %v2714_v21 = vadd.f32 %v1556_v47, %v1401_v18  ;;  %v1558_v22 = vpop.f32.mrb[5].mxu0 }
 0x3a3   :  { %v2715_v23 = vadd.f32 %v1558_v22, %v1405_v19 }
 0x3a4   :  { %v1561_v13 = vmax.f32 %v2714_v21, 0.0 }
 0x3a5   :  { %v1562_v28 = vmax.f32 %v2715_v23, 0.0 }
 0x3a6   :  { %v1575_v31 = vadd.f32 %v1568_v25, %v1561_v13 }
 0x3a7   :  { %v1576_v51 = vadd.f32 %v1572_v29, %v1562_v28 }
 0x3a9   :  { %1894 = vmatprep.mubr.msk.f32.mxu1 %vm1611_vm5, %v1576_v51 }
 0x3aa   :  { %1680 = vmatmul.mubr.f32.vlgmr.msra.gmra.mrb[10].mxu1 %v1575_v31 }
 0x3ab   :  { %2694 = vmatpush3.bf16.msra.mxu1 %v2693_v60  ;;  %2121 = vmatprep.mubr.msk.f32.mxu1 %vm2794_vm0, %v2792_v24 }
 0x3ac   :  { %2695 = vmatprep.subr.bf16.mxu1 %v2793_v30 }
 0x3af   :  { %2697 = vmatpush3.bf16.msra.mxu1 %v2696_v32 }
 0x3b0   :  { %2698 = vmatprep.subr.bf16.mxu1 %v2793_v30 }
 0x3b3   :  { %2700 = vmatpush3.bf16.msra.mxu1 %v2699_v36 }
 0x3b4   :  { %2701 = vmatprep.subr.bf16.mxu1 %v2793_v30 }
 0x3b7   :  { %2703 = vmatpush3.bf16.msra.mxu1 %v2702_v39 }
 0x3b8   :  { %2704 = vmatprep.subr.bf16.mxu1 %v2793_v30 }
 0x47d   :  { %v1681_v41 = vpop.f32.mrb[10].mxu1 }
 0x47e   :  { %v1682_v43 = vadd.f32 %v1893_v40, %v1681_v41  ;;  %v1683_v44 = vpop.f32.mrb[11].mxu1 }
 0x480   :  { %v1685_v45 = vmax.f32 %v1682_v43, 0.0 }
 0x482   :  { %2122 = vmatmul.mubr.msk.f32.vlgmr.msra.gmra.mrb[12].mxu1 %vm1701_vm6, %v1685_v45 }
 0x483   :  { %2132 = vmatprep.mubr.msk.f32.mxu1 %vm2794_vm0, %v2792_v24  ;;  %2706 = vmatpush3.bf16.msra.mxu1 %v2705_v52  ;;  %v1895_v24 = vld [vmem:[%s4471_s13] ss:$0 sm:$0xff]  ;;  %s2796_s13 = smov [#allocation5]  }
 0x484   :  { %2707 = vmatprep.subr.bf16.mxu1 %v2793_v30  ;;  %s1880_s14 = sshll.u32 %s2796_s13, 4  ;;  %s1881_s14 = int_to_ptr.vmem [resolvable:$true] %s1880_s14 }
 0x485   :  { %s2762_s15 = scalar_lea.vmem %s1881_s14, 32  ;;  %p2767_p9 = scmp.lt.s32.totalorder %s1881_s14, %s1881_s14 }
 0x486   :  { %p2763_p8 = scmp.ne.s32.totalorder %s1881_s14, %s2762_s15  ;;  %p2768_p10 = scmp.lt.s32.totalorder %s2762_s15, %s2762_s15 }
 0x487   :  { %2709 = vmatpush3.bf16.msra.mxu1 %v2708_v54 }
 0x488   :  { %p2769_p11 = por %p2768_p10, %p2767_p9 }
 0x48a   :  { %p2770_p12 = pnand %p2769_p11, %p2763_p8 }
 0x555   :  { %v1771_v57 = vpop.f32.mrb[12].mxu1 }
 0x556   :  { %v1772_v58 = vadd.f32 %v1895_v24, %v1771_v57  ;;  %v2123_v59 = vpop.f32.mrb[13].mxu1 }
 0x558   :  { %2734 = vtanh.f32 %v1772_v58 }
 0x562   :  { %v2735_v61 = vpop.eup %2734 }
 0x563   :  { %2133 = vmatmul.mubr.msk.f32.vlgmr.msra.gmra.mrb[14].mxu1 %vm1787_vm7, %v2735_v61 }
 0x636   :  { %v1857_v7 = vpop.f32.mrb[14].mxu1 }
 0x637   :  { %v1858_v63 = vadd.f32 %v1897_v62, %v1857_v7  ;;  %v2134_v30 = vpop.f32.mrb[15].mxu1 }
 0x639   :  { %v1862_v0 = vsel %vm1861_vm8, %v1858_v63, -inf }
 0x63a   :  { %1863 = vmax.xlane.f32.xlu0 %v1862_v0 }
 0x6c7   :  { %v1864_v34 = vpop.xlane.xlu0 %1863 }
 0x6c8   :  { %v1865_v1 = vsub.f32 %v1858_v63, %v1864_v34 }
 0x6ca   :  { %v1866_v2 = vmul.f32 1.442695, %v1865_v1 }
 0x6cc   :  { %2736 = vpow2.f32 %v1866_v2 }
 0x6d6   :  { %v2737_v3 = vpop.eup %2736 }
 0x6d7   :  { %v1868_v4 = vsel %vm1861_vm8, %v2737_v3, 0.0 }
 0x6d8   :  { %1869 = vadd.xlane.f32.xlu0 %v1868_v4 }
 0x765   :  { %v1870_v5 = vpop.xlane.xlu0 %1869 }
 0x766   :  { %2738 = vrcp.f32 %v1870_v5 }
 0x770   :  { %v2739_v6 = vpop.eup %2738 }
 0x771   :  { %v1872_v8 = vmul.f32 %v2739_v6, %v2737_v3 }
 0x773   :  { %1873 = vst.msk [vmem:[#allocation5] sm:$0x3] %vm1861_vm8, %v1872_v8 }
 0x774   :  { %2773 = shalt.err (!%p2770_p12)
}
 0x775   :  { %s2774_s2 = scalar_lea.hbm %s4474_s16, 32 }
 0x776   :  { %p2775_p13 = scmp.ne.s32.totalorder %s4474_s16, %s2774_s2  ;;  %p2778_p0 = scmp.lt.u32.totalorder %s2774_s2, %s4474_s16 }
 0x778   :  { %p2780_p1 = pnand %p2778_p0, %p2775_p13 }
 0x77a   :  { %2783 = shalt.err (!%p2780_p1)
}
 0x77b   :  { %1883 = dma.vmem_to_hbm [thread:$0]  %s1881_s14, 32, %s4474_s16, [#allocation4]  }
 0x77c   :  { %2786 = dma.done.wait [#allocation4], 32  }
 0x77d   :  { %2787 = vsyncadd [#allocation4], 4294967264 }
 0x77e   :  { %1887 = vsyncpa [#allocation3], 1 }
 0x77f   :  { %1888 = vsyncpa [#allocation4], 1 }

</bundles_post_ra>
